<compile_context>
chip_gen: v7x
topology: tpu7x:2x2x1
jax: 0.10.0
libtpu: 0.0.40
codegen_flags: <defaults>
</compile_context>

<pallas_src>
import functools

import jax
import jax.numpy as jnp
import numpy as np
from jax import lax
from jax.experimental import pallas as pl
from jax.experimental.pallas import tpu as pltpu

EPS = 1e-5
SUBLANE = 16          # bf16 sublane tile -> channel blocks padded to this


def _round_up(x, m):
    return ((x + m - 1) // m) * m


# ----------------------------------------------------------------------------
# In-kernel helpers (layout: rows = channels, lanes = flattened N*H*W = R)
# ----------------------------------------------------------------------------
def _im2col(x, tap_masks, W, out_dtype):
    """x: (Cp, R) f32 -> (9*Cp, R) im2col slab (tap-major, chan-minor).

    Spatial shifts are lane rotations (XLU slot); out-of-image (and
    batch-crossing) lanes are zeroed by the precomputed tap masks, so lane
    wraparound is harmless.  Each tap block is Cp rows (multiple of 16), so
    the concatenate is sublane-tile aligned -> no relayout copies.
    """
    Cp, R = x.shape
    taps = []
    i = 0
    for dy in (-1, 0, 1):
        for dx in (-1, 0, 1):
            d = dy * W + dx
            shift = (-d) % R
            t = pltpu.roll(x, shift, axis=1) if shift else x
            taps.append((t * tap_masks[i]).astype(out_dtype))
            i += 1
    return jnp.concatenate(taps, axis=0)


def _bn_train(y, g, b, inv_r):
    """BatchNorm2d, training mode, single pass (E[x^2] - E[x]^2). y:(C,R)."""
    mean = jnp.sum(y, axis=1, keepdims=True) * inv_r
    ex2 = jnp.sum(y * y, axis=1, keepdims=True) * inv_r
    var = ex2 - mean * mean
    return (y - mean) * lax.rsqrt(var + EPS) * g + b


def _dot(w, slab):
    # bf16 (or f32) operands, f32 accumulation on the MXU.
    return jnp.dot(w, slab, preferred_element_type=jnp.float32)


# ----------------------------------------------------------------------------
# Kernel 1: conv_offset branch -> (18,R) raw offsets [dy|dx], (9,R) sigmoid(mask)
# ----------------------------------------------------------------------------
def _offset_kernel(W, inv_r,
                   rgb_ref, tm_ref,
                   w1_ref, b1_ref, g1_ref, be1_ref,
                   woff_ref, boff_ref, wmsk_ref, bmsk_ref,
                   off_ref, msk_ref):
    tm = tm_ref[...]                                            # (9, R)
    slab = _im2col(rgb_ref[...], tm, W, jnp.bfloat16)           # (9*Cp, R) bf16
    a = _dot(w1_ref[...], slab) + b1_ref[...]                   # (Cp, R)
    a = _bn_train(a, g1_ref[...], be1_ref[...], inv_r)
    # Final conv_offset matmul kept in f32: its outputs feed a precision-
    # sensitive fractional bilinear gather.
    slab2 = _im2col(a, tm, W, jnp.float32)                      # (9*Cp, R) f32
    off_ref[...] = _dot(woff_ref[...], slab2) + boff_ref[...]   # (18, R)
    m_raw = _dot(wmsk_ref[...], slab2) + bmsk_ref[...]          # (9, R)
    msk_ref[...] = pl.reciprocal(1.0 + jnp.exp(-m_raw), approx=True)


# ----------------------------------------------------------------------------
# Kernel 2: deform matmul + residual + fusion + conv_out -> (1, R)
# ----------------------------------------------------------------------------
def _fusion_kernel(W, inv_r,
                   depth_ref, rgb_ref, cols_ref, tm_ref,
                   wd_ref, bd_ref,
                   wo1_ref, bo1_ref, go1_ref, beo1_ref,
                   wo2_ref, bo2_ref,
                   out_ref):
    # Modulated deformable conv == one matmul over pre-gathered, pre-modulated
    # im2col columns (gather done in the wrapper).
    deform = _dot(wd_ref[...], cols_ref[...]) + bd_ref[...]     # (Cp, R)
    d2 = depth_ref[...] + deform                                # residual
    fusion = jnp.concatenate([d2, rgb_ref[...]], axis=0)        # (2*Cp, R)
    fusion = jnp.maximum(fusion, 0.0)                           # ReLU
    tm = tm_ref[...]
    slab1 = _im2col(fusion, tm, W, jnp.bfloat16)                # (18*Cp, R)
    f = _dot(wo1_ref[...], slab1) + bo1_ref[...]                # (Cp, R)
    f = _bn_train(f, go1_ref[...], beo1_ref[...], inv_r)
    f = jnp.maximum(f, 0.0)
    # TODO(synk): nn.Dropout(0.1) (training mode) treated as identity.
    slab2 = _im2col(f, tm, W, jnp.bfloat16)                     # (9*Cp, R)
    out_ref[...] = _dot(wo2_ref[...], slab2) + bo2_ref[...]     # (1, R), lane-dense


# ----------------------------------------------------------------------------
# Wrapper
# ----------------------------------------------------------------------------
def _vmem_limit_bytes():
    phys = 64 * 1024 * 1024
    try:
        phys = int(pltpu.get_tpu_info().vmem_capacity_bytes)
    except Exception:
        pass
    # ~8 MiB headroom; allow larger working sets on 128 MiB parts (v5e/v6e).
    return int(max(32 * 1024 * 1024, min(phys - 8 * 1024 * 1024, 100 * 1024 * 1024)))


def dgf_block(feat_rgb, feat_depth, p):
    """Pallas implementation of DGF_Block.forward (NCHW in, NCHW out)."""
    N, C, H, W = feat_rgb.shape
    R = N * H * W
    Cp = _round_up(C, SUBLANE)
    f32 = jnp.float32
    inv_r = 1.0 / R

    def to_cf(x):  # NCHW -> (Cp, R) channel-padded; lane r = ((n*H)+h)*W + w
        xc = jnp.transpose(x.astype(f32), (1, 0, 2, 3)).reshape(C, R)
        return jnp.pad(xc, ((0, Cp - C), (0, 0)))

    rgb_cf = to_cf(feat_rgb)
    depth_cf = to_cf(feat_depth)

    # 3x3 tap validity masks, precomputed once (static function of lane index).
    h_idx = jnp.tile(jnp.repeat(jnp.arange(H, dtype=jnp.int32), W), N)
    w_idx = jnp.tile(jnp.arange(W, dtype=jnp.int32), N * H)
    mlist = []
    for dy in (-1, 0, 1):
        for dx in (-1, 0, 1):
            mlist.append((h_idx + dy >= 0) & (h_idx + dy < H) &
                         (w_idx + dx >= 0) & (w_idx + dx < W))
    tap_masks = jnp.stack(mlist).astype(f32)                    # (9, R)

    vmem = pl.BlockSpec(memory_space=pltpu.MemorySpace.VMEM)
    cparams = pltpu.CompilerParams(vmem_limit_bytes=_vmem_limit_bytes())

    # --------------------- kernel 1: conv_offset branch ----------------------
    off, mod = pl.pallas_call(
        functools.partial(_offset_kernel, W, inv_r),
        out_shape=(jax.ShapeDtypeStruct((18, R), f32),
                   jax.ShapeDtypeStruct((9, R), f32)),
        in_specs=[vmem] * 10,
        out_specs=(vmem, vmem),
        compiler_params=cparams,
    )(rgb_cf, tap_masks,
      p['w1m'], p['b1'], p['g1'], p['be1'],
      p['woffm'], p['boff'], p['wmskm'], p['bmsk'])

    # ------------- modulated deformable bilinear sampling (XLA) --------------
    # TODO(synk): data-dependent fractional gather has no clean Pallas/TPU
    # equivalent; done with an XLA gather between the two kernels.
    off_y = off[:9].reshape(9, N, H, W)          # contiguous slices (no stride)
    off_x = off[9:18].reshape(9, N, H, W)
    mod = mod.reshape(9, N, H, W)                # sigmoid(mask) per tap
    x_nhwc = jnp.transpose(feat_depth.astype(f32), (0, 2, 3, 1))    # (N,H,W,C)

    bidx = jnp.arange(N)[None, :, None, None]
    hh = jnp.arange(H, dtype=f32)[None, None, :, None]
    ww = jnp.arange(W, dtype=f32)[None, None, None, :]
    ky = (jnp.arange(9) // 3).astype(f32).reshape(9, 1, 1, 1)
    kx = (jnp.arange(9) % 3).astype(f32).reshape(9, 1, 1, 1)
    py = hh + (ky - 1.0) + off_y                 # (9,N,H,W)
    px = ww + (kx - 1.0) + off_x
    y0 = jnp.floor(py)
    x0 = jnp.floor(px)
    fy = py - y0
    fx = px - x0

    def corner(yi, xi, wgt):
        valid = (yi >= 0) & (yi <= H - 1) & (xi >= 0) & (xi <= W - 1)
        yc = jnp.clip(yi, 0, H - 1).astype(jnp.int32)
        xc = jnp.clip(xi, 0, W - 1).astype(jnp.int32)
        g = x_nhwc[bidx, yc, xc]                 # (9,N,H,W,C)
        return (wgt * valid.astype(f32))[..., None] * g

    val = (corner(y0, x0, (1 - fy) * (1 - fx)) +
           corner(y0, x0 + 1.0, (1 - fy) * fx) +
           corner(y0 + 1.0, x0, fy * (1 - fx)) +
           corner(y0 + 1.0, x0 + 1.0, fy * fx))
    val = val * mod[..., None]                   # modulation
    cols = jnp.transpose(val, (0, 4, 1, 2, 3)).reshape(9, C, R)
    cols = jnp.pad(cols, ((0, 0), (0, Cp - C), (0, 0)))
    cols = cols.reshape(9 * Cp, R).astype(jnp.bfloat16)

    # ------------- kernel 2: deform matmul + residual + conv_out -------------
    out = pl.pallas_call(
        functools.partial(_fusion_kernel, W, inv_r),
        out_shape=jax.ShapeDtypeStruct((1, R), f32),
        in_specs=[vmem] * 12,
        out_specs=vmem,
        compiler_params=cparams,
    )(depth_cf, rgb_cf, cols, tap_masks,
      p['wdm'], p['bd'],
      p['wo1m'], p['bo1'], p['go1'], p['beo1'],
      p['wo2m'], p['bo2'])

    return out.reshape(N, H, W)[:, None, :, :]


# ----------------------------------------------------------------------------
# Parameters (PyTorch layout for the reference + padded kernel layout)
# ----------------------------------------------------------------------------
def _mat(w, cp_in, cp_out, dtype, groups=1):
    """(Cout, g*Cg, 3, 3) PyTorch conv weight -> (cp_out, 9*g*cp_in) matmul
    weight, tap-major / group-major / chan-minor; channel groups zero-padded
    to cp_in, output rows zero-padded to cp_out."""
    cout, cin = w.shape[0], w.shape[1]
    cg = cin // groups
    wt = jnp.transpose(w, (0, 2, 3, 1)).reshape(cout, 3, 3, groups, cg)
    wt = jnp.pad(wt, ((0, 0), (0, 0), (0, 0), (0, 0), (0, cp_in - cg)))
    wt = wt.reshape(cout, 9 * groups * cp_in)
    wt = jnp.pad(wt, ((0, cp_out - cout), (0, 0)))
    return wt.astype(dtype)


def _col(v, cp_out):
    v = v.reshape(-1, 1).astype(jnp.float32)
    return jnp.pad(v, ((0, cp_out - v.shape[0]), (0, 0)))


def init_params(key, chan, *, offset_conv_scale=0.0):
    ks = jax.random.split(key, 14)
    f32 = jnp.float32
    bf16 = jnp.bfloat16
    cp = _round_up(chan, SUBLANE)

    def conv_w(k, cout, cin):
        return 0.2 * jax.random.normal(k, (cout, cin, 3, 3), f32)

    w1 = conv_w(ks[0], chan, chan)
    b1 = 0.1 * jax.random.normal(ks[1], (chan,), f32)
    g1 = 1.0 + 0.1 * jax.random.normal(ks[2], (chan,), f32)
    be1 = 0.1 * jax.random.normal(ks[3], (chan,), f32)
    if offset_conv_scale > 0.0:
        # Optional: exercise the deformable gather (module default is zero-init).
        woff = offset_conv_scale * jax.random.normal(ks[12], (27, chan, 3, 3), f32)
        boff = 0.5 * offset_conv_scale * jax.random.normal(ks[13], (27,), f32)
    else:
        # conv_offset[-1] is zero-initialised by the module (.weight/.bias zero_()).
        woff = jnp.zeros((27, chan, 3, 3), f32)
        boff = jnp.zeros((27,), f32)
    wd = conv_w(ks[4], chan, chan)
    bd = 0.1 * jax.random.normal(ks[5], (chan,), f32)
    wo1 = conv_w(ks[6], chan, 2 * chan)
    bo1 = 0.1 * jax.random.normal(ks[7], (chan,), f32)
    go1 = 1.0 + 0.1 * jax.random.normal(ks[8], (chan,), f32)
    beo1 = 0.1 * jax.random.normal(ks[9], (chan,), f32)
    wo2 = conv_w(ks[10], 1, chan)
    bo2 = 0.1 * jax.random.normal(ks[11], (1,), f32)

    # Pre-permute conv_offset rows to [dy taps 0..8 | dx taps 0..8 | mask 0..8]
    # (mmcv convention: offset[:, 2k] = dy_k, offset[:, 2k+1] = dx_k), so the
    # wrapper never needs strided row slices.
    perm = np.array(list(range(0, 18, 2)) + list(range(1, 18, 2)))

    return dict(
        # PyTorch-layout params (pure-JAX reference)
        w1=w1, b1v=b1, g1v=g1, be1v=be1, woff=woff, boffv=boff,
        wd=wd, bdv=bd, wo1=wo1, bo1v=bo1, go1v=go1, beo1v=beo1,
        wo2=wo2, bo2v=bo2,
        # kernel-layout params (channel blocks zero-padded to the sublane tile)
        w1m=_mat(w1, cp, cp, bf16), b1=_col(b1, cp),
        g1=_col(g1, cp), be1=_col(be1, cp),
        woffm=_mat(woff[perm], cp, 18, f32), boff=_col(boff[perm], 18),
        wmskm=_mat(woff[18:27], cp, 9, f32), bmsk=_col(boff[18:27], 9),
        wdm=_mat(wd, cp, cp, bf16), bd=_col(bd, cp),
        wo1m=_mat(wo1, cp, cp, bf16, groups=2), bo1=_col(bo1, cp),
        go1=_col(go1, cp), beo1=_col(beo1, cp),
        wo2m=_mat(wo2, cp, 1, bf16), bo2=_col(bo2, 1),
    )


# ----------------------------------------------------------------------------
# Pure-JAX reference of DGF_Block.forward (f32, HIGHEST-precision convs)
# ----------------------------------------------------------------------------
def _bn_ref(y, g, b):
    mean = jnp.mean(y, axis=(0, 2, 3), keepdims=True)
    var = jnp.mean(jnp.square(y - mean), axis=(0, 2, 3), keepdims=True)
    return ((y - mean) * lax.rsqrt(var + EPS) * g.reshape(1, -1, 1, 1)
            + b.reshape(1, -1, 1, 1))


def _conv_ref(x, w, b):
    dn = ('NCHW', 'OIHW', 'NCHW')
    y = lax.conv_general_dilated(x, w, (1, 1), ((1, 1), (1, 1)),
                                 dimension_numbers=dn,
                                 precision=lax.Precision.HIGHEST)
    return y + b.reshape(1, -1, 1, 1)


def _mdcn_ref(x_nchw, offset, mask, w, b):
    """Reference ModulatedDeformConv2d (3x3, stride 1, pad 1, dilation 1)."""
    N, C, H, W = x_nchw.shape
    x = jnp.transpose(x_nchw, (0, 2, 3, 1))
    bidx = jnp.arange(N)[:, None, None]
    hh = jnp.arange(H, dtype=jnp.float32)[None, :, None]
    ww = jnp.arange(W, dtype=jnp.float32)[None, None, :]
    out = jnp.zeros((N, H, W, w.shape[0]), jnp.float32)
    for k in range(9):
        ky, kx = k // 3, k % 3
        py = hh + (ky - 1) + offset[:, 2 * k]
        px = ww + (kx - 1) + offset[:, 2 * k + 1]
        y0, x0 = jnp.floor(py), jnp.floor(px)
        fy, fx = py - y0, px - x0
        val = jnp.zeros((N, H, W, C), jnp.float32)
        for yi, xi, wt in ((y0, x0, (1 - fy) * (1 - fx)),
                           (y0, x0 + 1, (1 - fy) * fx),
                           (y0 + 1, x0, fy * (1 - fx)),
                           (y0 + 1, x0 + 1, fy * fx)):
            ok = (yi >= 0) & (yi <= H - 1) & (xi >= 0) & (xi <= W - 1)
            yc = jnp.clip(yi, 0, H - 1).astype(jnp.int32)
            xc = jnp.clip(xi, 0, W - 1).astype(jnp.int32)
            val = val + (wt * ok.astype(jnp.float32))[..., None] * x[bidx, yc, xc]
        val = val * mask[:, k][..., None]
        out = out + jnp.einsum('nhwc,oc->nhwo', val, w[:, :, ky, kx],
                               precision=lax.Precision.HIGHEST)
    out = out + b.reshape(1, 1, 1, -1)
    return jnp.transpose(out, (0, 3, 1, 2))


def reference(feat_rgb, feat_depth, p):
    out = _conv_ref(feat_rgb, p['w1'], p['b1v'])
    out = _bn_ref(out, p['g1v'], p['be1v'])
    out = _conv_ref(out, p['woff'], p['boffv'])
    o1, o2, m = jnp.split(out, 3, axis=1)
    offset = jnp.concatenate([o1, o2], axis=1)
    m = 1.0 / (1.0 + jnp.exp(-m))
    deform = _mdcn_ref(feat_depth, offset, m, p['wd'], p['bdv'])
    fd = feat_depth + deform
    fusion = jnp.concatenate([fd, feat_rgb], axis=1)
    f = jnp.maximum(fusion, 0.0)
    f = _conv_ref(f, p['wo1'], p['bo1v'])
    f = _bn_ref(f, p['go1v'], p['beo1v'])
    f = jnp.maximum(f, 0.0)
    # Dropout treated as identity (see TODO in the kernel).
    f = _conv_ref(f, p['wo2'], p['bo2v'])
    return f


if __name__ == "__main__":
    N, C, H, W = 2, 4, 16, 16
    key = jax.random.PRNGKey(0)
    k_rgb, k_depth, k_p0, k_p1 = jax.random.split(key, 4)
    feat_rgb = jax.random.normal(k_rgb, (N, C, H, W), jnp.float32)
    feat_depth = jax.random.normal(k_depth, (N, C, H, W), jnp.float32)

    # Test 1: module-default parameters (conv_offset[-1] zero-initialised).
    params = init_params(k_p0, C)
    out = jax.block_until_ready(dgf_block(feat_rgb, feat_depth, params))
    ref = jax.block_until_ready(reference(feat_rgb, feat_depth, params))
    assert out.shape == (N, 1, H, W)
    # Tolerance reflects bf16 MXU operands (f32 accumulation) vs f32 reference.
    np.testing.assert_allclose(np.asarray(out), np.asarray(ref),
                               rtol=5e-2, atol=5e-2)

    # Test 2: randomised conv_offset final conv -> exercises the deformable
    # bilinear gather, the dy/dx interleave convention and mask sigmoid path.
    params_rnd = init_params(k_p1, C, offset_conv_scale=0.05)
    out2 = jax.block_until_ready(dgf_block(feat_rgb, feat_depth, params_rnd))
    ref2 = jax.block_until_ready(reference(feat_rgb, feat_depth, params_rnd))
    np.testing.assert_allclose(np.asarray(out2), np.asarray(ref2),
                               rtol=5e-2, atol=5e-2)

    print("KERNEL_OK")
</pallas_src>

<mosaic_0001>
module attributes {stable_mosaic.version = 11 : i64} {
  func.func @_offset_kernel(%arg0: memref<16x512xf32, #tpu.memory_space<vmem>>, %arg1: memref<9x512xf32, #tpu.memory_space<vmem>>, %arg2: memref<16x144xbf16, #tpu.memory_space<vmem>>, %arg3: memref<16x1xf32, #tpu.memory_space<vmem>>, %arg4: memref<16x1xf32, #tpu.memory_space<vmem>>, %arg5: memref<16x1xf32, #tpu.memory_space<vmem>>, %arg6: memref<18x144xf32, #tpu.memory_space<vmem>>, %arg7: memref<18x1xf32, #tpu.memory_space<vmem>>, %arg8: memref<9x144xf32, #tpu.memory_space<vmem>>, %arg9: memref<9x1xf32, #tpu.memory_space<vmem>>, %arg10: memref<18x512xf32, #tpu.memory_space<vmem>>, %arg11: memref<9x512xf32, #tpu.memory_space<vmem>>) attributes {dimension_semantics = [], scalar_prefetch = 0 : i64, scratch_operands = 0 : i64, tpu.core_type = #tpu.core_type<tc>} {
    %c0 = arith.constant 0 : index
    %c0_0 = arith.constant 0 : index
    %0 = vector.load %arg1[%c0, %c0_0] : memref<9x512xf32, #tpu.memory_space<vmem>>, vector<9x512xf32>
    %c0_1 = arith.constant 0 : index
    %c0_2 = arith.constant 0 : index
    %1 = vector.load %arg0[%c0_1, %c0_2] : memref<16x512xf32, #tpu.memory_space<vmem>>, vector<16x512xf32>
    %c17_i32 = arith.constant 17 : i32
    %2 = tpu.dynamic_rotate %1 by %c17_i32 dim 1 : vector<16x512xf32>, i32 -> vector<16x512xf32>
    %3 = vector.extract_strided_slice %0 {offsets = [0, 0], sizes = [1, 512], strides = [1, 1]} : vector<9x512xf32> to vector<1x512xf32>
    %4 = vector.shape_cast %3 : vector<1x512xf32> to vector<512xf32>
    %5 = vector.shape_cast %4 : vector<512xf32> to vector<1x512xf32>
    %6 = vector.broadcast %5 : vector<1x512xf32> to vector<16x512xf32>
    %7 = arith.mulf %2, %6 : vector<16x512xf32>
    %8 = arith.truncf %7 : vector<16x512xf32> to vector<16x512xbf16>
    %c16_i32 = arith.constant 16 : i32
    %9 = tpu.dynamic_rotate %1 by %c16_i32 dim 1 : vector<16x512xf32>, i32 -> vector<16x512xf32>
    %10 = vector.extract_strided_slice %0 {offsets = [1, 0], sizes = [1, 512], strides = [1, 1]} : vector<9x512xf32> to vector<1x512xf32>
    %11 = vector.shape_cast %10 : vector<1x512xf32> to vector<512xf32>
    %12 = vector.shape_cast %11 : vector<512xf32> to vector<1x512xf32>
    %13 = vector.broadcast %12 : vector<1x512xf32> to vector<16x512xf32>
    %14 = arith.mulf %9, %13 : vector<16x512xf32>
    %15 = arith.truncf %14 : vector<16x512xf32> to vector<16x512xbf16>
    %c15_i32 = arith.constant 15 : i32
    %16 = tpu.dynamic_rotate %1 by %c15_i32 dim 1 : vector<16x512xf32>, i32 -> vector<16x512xf32>
    %17 = vector.extract_strided_slice %0 {offsets = [2, 0], sizes = [1, 512], strides = [1, 1]} : vector<9x512xf32> to vector<1x512xf32>
    %18 = vector.shape_cast %17 : vector<1x512xf32> to vector<512xf32>
    %19 = vector.shape_cast %18 : vector<512xf32> to vector<1x512xf32>
    %20 = vector.broadcast %19 : vector<1x512xf32> to vector<16x512xf32>
    %21 = arith.mulf %16, %20 : vector<16x512xf32>
    %22 = arith.truncf %21 : vector<16x512xf32> to vector<16x512xbf16>
    %c1_i32 = arith.constant 1 : i32
    %23 = tpu.dynamic_rotate %1 by %c1_i32 dim 1 : vector<16x512xf32>, i32 -> vector<16x512xf32>
    %24 = vector.extract_strided_slice %0 {offsets = [3, 0], sizes = [1, 512], strides = [1, 1]} : vector<9x512xf32> to vector<1x512xf32>
    %25 = vector.shape_cast %24 : vector<1x512xf32> to vector<512xf32>
    %26 = vector.shape_cast %25 : vector<512xf32> to vector<1x512xf32>
    %27 = vector.broadcast %26 : vector<1x512xf32> to vector<16x512xf32>
    %28 = arith.mulf %23, %27 : vector<16x512xf32>
    %29 = arith.truncf %28 : vector<16x512xf32> to vector<16x512xbf16>
    %30 = vector.extract_strided_slice %0 {offsets = [4, 0], sizes = [1, 512], strides = [1, 1]} : vector<9x512xf32> to vector<1x512xf32>
    %31 = vector.shape_cast %30 : vector<1x512xf32> to vector<512xf32>
    %32 = vector.shape_cast %31 : vector<512xf32> to vector<1x512xf32>
    %33 = vector.broadcast %32 : vector<1x512xf32> to vector<16x512xf32>
    %34 = arith.mulf %1, %33 : vector<16x512xf32>
    %35 = arith.truncf %34 : vector<16x512xf32> to vector<16x512xbf16>
    %c511_i32 = arith.constant 511 : i32
    %36 = tpu.dynamic_rotate %1 by %c511_i32 dim 1 : vector<16x512xf32>, i32 -> vector<16x512xf32>
    %37 = vector.extract_strided_slice %0 {offsets = [5, 0], sizes = [1, 512], strides = [1, 1]} : vector<9x512xf32> to vector<1x512xf32>
    %38 = vector.shape_cast %37 : vector<1x512xf32> to vector<512xf32>
    %39 = vector.shape_cast %38 : vector<512xf32> to vector<1x512xf32>
    %40 = vector.broadcast %39 : vector<1x512xf32> to vector<16x512xf32>
    %41 = arith.mulf %36, %40 : vector<16x512xf32>
    %42 = arith.truncf %41 : vector<16x512xf32> to vector<16x512xbf16>
    %c497_i32 = arith.constant 497 : i32
    %43 = tpu.dynamic_rotate %1 by %c497_i32 dim 1 : vector<16x512xf32>, i32 -> vector<16x512xf32>
    %44 = vector.extract_strided_slice %0 {offsets = [6, 0], sizes = [1, 512], strides = [1, 1]} : vector<9x512xf32> to vector<1x512xf32>
    %45 = vector.shape_cast %44 : vector<1x512xf32> to vector<512xf32>
    %46 = vector.shape_cast %45 : vector<512xf32> to vector<1x512xf32>
    %47 = vector.broadcast %46 : vector<1x512xf32> to vector<16x512xf32>
    %48 = arith.mulf %43, %47 : vector<16x512xf32>
    %49 = arith.truncf %48 : vector<16x512xf32> to vector<16x512xbf16>
    %c496_i32 = arith.constant 496 : i32
    %50 = tpu.dynamic_rotate %1 by %c496_i32 dim 1 : vector<16x512xf32>, i32 -> vector<16x512xf32>
    %51 = vector.extract_strided_slice %0 {offsets = [7, 0], sizes = [1, 512], strides = [1, 1]} : vector<9x512xf32> to vector<1x512xf32>
    %52 = vector.shape_cast %51 : vector<1x512xf32> to vector<512xf32>
    %53 = vector.shape_cast %52 : vector<512xf32> to vector<1x512xf32>
    %54 = vector.broadcast %53 : vector<1x512xf32> to vector<16x512xf32>
    %55 = arith.mulf %50, %54 : vector<16x512xf32>
    %56 = arith.truncf %55 : vector<16x512xf32> to vector<16x512xbf16>
    %c495_i32 = arith.constant 495 : i32
    %57 = tpu.dynamic_rotate %1 by %c495_i32 dim 1 : vector<16x512xf32>, i32 -> vector<16x512xf32>
    %58 = vector.extract_strided_slice %0 {offsets = [8, 0], sizes = [1, 512], strides = [1, 1]} : vector<9x512xf32> to vector<1x512xf32>
    %59 = vector.shape_cast %58 : vector<1x512xf32> to vector<512xf32>
    %60 = vector.shape_cast %59 : vector<512xf32> to vector<1x512xf32>
    %61 = vector.broadcast %60 : vector<1x512xf32> to vector<16x512xf32>
    %62 = arith.mulf %57, %61 : vector<16x512xf32>
    %63 = arith.truncf %62 : vector<16x512xf32> to vector<16x512xbf16>
    %64 = tpu.concatenate %8, %15, %22, %29, %35, %42, %49, %56, %63 in 0 : vector<16x512xbf16>, vector<16x512xbf16>, vector<16x512xbf16>, vector<16x512xbf16>, vector<16x512xbf16>, vector<16x512xbf16>, vector<16x512xbf16>, vector<16x512xbf16>, vector<16x512xbf16> -> vector<144x512xbf16>
    %c0_3 = arith.constant 0 : index
    %c0_4 = arith.constant 0 : index
    %65 = vector.load %arg2[%c0_3, %c0_4] : memref<16x144xbf16, #tpu.memory_space<vmem>>, vector<16x144xbf16>
    %cst = arith.constant dense<0.000000e+00> : vector<16x512xf32>
    %66 = tpu.matmul %65, %64, %cst {dimension_numbers = #tpu.dot_dimension_numbers<[1], [0], [0], [1], [0, 0, 1, 1], [], []>} : vector<16x144xbf16>, vector<144x512xbf16>, vector<16x512xf32> -> vector<16x512xf32>
    %c0_5 = arith.constant 0 : index
    %c0_6 = arith.constant 0 : index
    %67 = vector.load %arg3[%c0_5, %c0_6] : memref<16x1xf32, #tpu.memory_space<vmem>>, vector<16x1xf32>
    %68 = vector.broadcast %67 : vector<16x1xf32> to vector<16x512xf32>
    %69 = arith.addf %66, %68 : vector<16x512xf32>
    %c0_7 = arith.constant 0 : index
    %c0_8 = arith.constant 0 : index
    %70 = vector.load %arg4[%c0_7, %c0_8] : memref<16x1xf32, #tpu.memory_space<vmem>>, vector<16x1xf32>
    %c0_9 = arith.constant 0 : index
    %c0_10 = arith.constant 0 : index
    %71 = vector.load %arg5[%c0_9, %c0_10] : memref<16x1xf32, #tpu.memory_space<vmem>>, vector<16x1xf32>
    %cst_11 = arith.constant dense<0.000000e+00> : vector<16xf32>
    %72 = vector.multi_reduction <add>, %69, %cst_11 [1] : vector<16x512xf32> to vector<16xf32>
    %73 = vector.shape_cast %72 : vector<16xf32> to vector<16x1xf32>
    %cst_12 = arith.constant 0.001953125 : f32
    %74 = vector.broadcast %cst_12 : f32 to vector<16x1xf32>
    %75 = arith.mulf %73, %74 : vector<16x1xf32>
    %76 = arith.mulf %69, %69 : vector<16x512xf32>
    %cst_13 = arith.constant dense<0.000000e+00> : vector<16xf32>
    %77 = vector.multi_reduction <add>, %76, %cst_13 [1] : vector<16x512xf32> to vector<16xf32>
    %78 = vector.shape_cast %77 : vector<16xf32> to vector<16x1xf32>
    %cst_14 = arith.constant 0.001953125 : f32
    %79 = vector.broadcast %cst_14 : f32 to vector<16x1xf32>
    %80 = arith.mulf %78, %79 : vector<16x1xf32>
    %81 = arith.mulf %75, %75 : vector<16x1xf32>
    %82 = arith.subf %80, %81 : vector<16x1xf32>
    %83 = vector.broadcast %75 : vector<16x1xf32> to vector<16x512xf32>
    %84 = arith.subf %69, %83 : vector<16x512xf32>
    %cst_15 = arith.constant 9.99999974E-6 : f32
    %85 = vector.broadcast %cst_15 : f32 to vector<16x1xf32>
    %86 = arith.addf %82, %85 : vector<16x1xf32>
    %87 = math.rsqrt %86 : vector<16x1xf32>
    %88 = vector.broadcast %87 : vector<16x1xf32> to vector<16x512xf32>
    %89 = arith.mulf %84, %88 : vector<16x512xf32>
    %90 = vector.broadcast %70 : vector<16x1xf32> to vector<16x512xf32>
    %91 = arith.mulf %89, %90 : vector<16x512xf32>
    %92 = vector.broadcast %71 : vector<16x1xf32> to vector<16x512xf32>
    %93 = arith.addf %91, %92 : vector<16x512xf32>
    %c17_i32_16 = arith.constant 17 : i32
    %94 = tpu.dynamic_rotate %93 by %c17_i32_16 dim 1 : vector<16x512xf32>, i32 -> vector<16x512xf32>
    %95 = vector.extract_strided_slice %0 {offsets = [0, 0], sizes = [1, 512], strides = [1, 1]} : vector<9x512xf32> to vector<1x512xf32>
    %96 = vector.shape_cast %95 : vector<1x512xf32> to vector<512xf32>
    %97 = vector.shape_cast %96 : vector<512xf32> to vector<1x512xf32>
    %98 = vector.broadcast %97 : vector<1x512xf32> to vector<16x512xf32>
    %99 = arith.mulf %94, %98 : vector<16x512xf32>
    %c16_i32_17 = arith.constant 16 : i32
    %100 = tpu.dynamic_rotate %93 by %c16_i32_17 dim 1 : vector<16x512xf32>, i32 -> vector<16x512xf32>
    %101 = vector.extract_strided_slice %0 {offsets = [1, 0], sizes = [1, 512], strides = [1, 1]} : vector<9x512xf32> to vector<1x512xf32>
    %102 = vector.shape_cast %101 : vector<1x512xf32> to vector<512xf32>
    %103 = vector.shape_cast %102 : vector<512xf32> to vector<1x512xf32>
    %104 = vector.broadcast %103 : vector<1x512xf32> to vector<16x512xf32>
    %105 = arith.mulf %100, %104 : vector<16x512xf32>
    %c15_i32_18 = arith.constant 15 : i32
    %106 = tpu.dynamic_rotate %93 by %c15_i32_18 dim 1 : vector<16x512xf32>, i32 -> vector<16x512xf32>
    %107 = vector.extract_strided_slice %0 {offsets = [2, 0], sizes = [1, 512], strides = [1, 1]} : vector<9x512xf32> to vector<1x512xf32>
    %108 = vector.shape_cast %107 : vector<1x512xf32> to vector<512xf32>
    %109 = vector.shape_cast %108 : vector<512xf32> to vector<1x512xf32>
    %110 = vector.broadcast %109 : vector<1x512xf32> to vector<16x512xf32>
    %111 = arith.mulf %106, %110 : vector<16x512xf32>
    %c1_i32_19 = arith.constant 1 : i32
    %112 = tpu.dynamic_rotate %93 by %c1_i32_19 dim 1 : vector<16x512xf32>, i32 -> vector<16x512xf32>
    %113 = vector.extract_strided_slice %0 {offsets = [3, 0], sizes = [1, 512], strides = [1, 1]} : vector<9x512xf32> to vector<1x512xf32>
    %114 = vector.shape_cast %113 : vector<1x512xf32> to vector<512xf32>
    %115 = vector.shape_cast %114 : vector<512xf32> to vector<1x512xf32>
    %116 = vector.broadcast %115 : vector<1x512xf32> to vector<16x512xf32>
    %117 = arith.mulf %112, %116 : vector<16x512xf32>
    %118 = vector.extract_strided_slice %0 {offsets = [4, 0], sizes = [1, 512], strides = [1, 1]} : vector<9x512xf32> to vector<1x512xf32>
    %119 = vector.shape_cast %118 : vector<1x512xf32> to vector<512xf32>
    %120 = vector.shape_cast %119 : vector<512xf32> to vector<1x512xf32>
    %121 = vector.broadcast %120 : vector<1x512xf32> to vector<16x512xf32>
    %122 = arith.mulf %93, %121 : vector<16x512xf32>
    %c511_i32_20 = arith.constant 511 : i32
    %123 = tpu.dynamic_rotate %93 by %c511_i32_20 dim 1 : vector<16x512xf32>, i32 -> vector<16x512xf32>
    %124 = vector.extract_strided_slice %0 {offsets = [5, 0], sizes = [1, 512], strides = [1, 1]} : vector<9x512xf32> to vector<1x512xf32>
    %125 = vector.shape_cast %124 : vector<1x512xf32> to vector<512xf32>
    %126 = vector.shape_cast %125 : vector<512xf32> to vector<1x512xf32>
    %127 = vector.broadcast %126 : vector<1x512xf32> to vector<16x512xf32>
    %128 = arith.mulf %123, %127 : vector<16x512xf32>
    %c497_i32_21 = arith.constant 497 : i32
    %129 = tpu.dynamic_rotate %93 by %c497_i32_21 dim 1 : vector<16x512xf32>, i32 -> vector<16x512xf32>
    %130 = vector.extract_strided_slice %0 {offsets = [6, 0], sizes = [1, 512], strides = [1, 1]} : vector<9x512xf32> to vector<1x512xf32>
    %131 = vector.shape_cast %130 : vector<1x512xf32> to vector<512xf32>
    %132 = vector.shape_cast %131 : vector<512xf32> to vector<1x512xf32>
    %133 = vector.broadcast %132 : vector<1x512xf32> to vector<16x512xf32>
    %134 = arith.mulf %129, %133 : vector<16x512xf32>
    %c496_i32_22 = arith.constant 496 : i32
    %135 = tpu.dynamic_rotate %93 by %c496_i32_22 dim 1 : vector<16x512xf32>, i32 -> vector<16x512xf32>
    %136 = vector.extract_strided_slice %0 {offsets = [7, 0], sizes = [1, 512], strides = [1, 1]} : vector<9x512xf32> to vector<1x512xf32>
    %137 = vector.shape_cast %136 : vector<1x512xf32> to vector<512xf32>
    %138 = vector.shape_cast %137 : vector<512xf32> to vector<1x512xf32>
    %139 = vector.broadcast %138 : vector<1x512xf32> to vector<16x512xf32>
    %140 = arith.mulf %135, %139 : vector<16x512xf32>
    %c495_i32_23 = arith.constant 495 : i32
    %141 = tpu.dynamic_rotate %93 by %c495_i32_23 dim 1 : vector<16x512xf32>, i32 -> vector<16x512xf32>
    %142 = vector.extract_strided_slice %0 {offsets = [8, 0], sizes = [1, 512], strides = [1, 1]} : vector<9x512xf32> to vector<1x512xf32>
    %143 = vector.shape_cast %142 : vector<1x512xf32> to vector<512xf32>
    %144 = vector.shape_cast %143 : vector<512xf32> to vector<1x512xf32>
    %145 = vector.broadcast %144 : vector<1x512xf32> to vector<16x512xf32>
    %146 = arith.mulf %141, %145 : vector<16x512xf32>
    %147 = tpu.concatenate %99, %105, %111, %117, %122, %128, %134, %140, %146 in 0 : vector<16x512xf32>, vector<16x512xf32>, vector<16x512xf32>, vector<16x512xf32>, vector<16x512xf32>, vector<16x512xf32>, vector<16x512xf32>, vector<16x512xf32>, vector<16x512xf32> -> vector<144x512xf32>
    %c0_24 = arith.constant 0 : index
    %c0_25 = arith.constant 0 : index
    %148 = vector.load %arg6[%c0_24, %c0_25] : memref<18x144xf32, #tpu.memory_space<vmem>>, vector<18x144xf32>
    %cst_26 = arith.constant dense<0.000000e+00> : vector<18x512xf32>
    %149 = tpu.matmul %148, %147, %cst_26 {dimension_numbers = #tpu.dot_dimension_numbers<[1], [0], [0], [1], [0, 0, 1, 1], [], []>} : vector<18x144xf32>, vector<144x512xf32>, vector<18x512xf32> -> vector<18x512xf32>
    %c0_27 = arith.constant 0 : index
    %c0_28 = arith.constant 0 : index
    %150 = vector.load %arg7[%c0_27, %c0_28] : memref<18x1xf32, #tpu.memory_space<vmem>>, vector<18x1xf32>
    %151 = vector.broadcast %150 : vector<18x1xf32> to vector<18x512xf32>
    %152 = arith.addf %149, %151 : vector<18x512xf32>
    %c0_29 = arith.constant 0 : index
    %c0_30 = arith.constant 0 : index
    %153 = vector.load %arg10[%c0_29, %c0_30] : memref<18x512xf32, #tpu.memory_space<vmem>>, vector<18x512xf32>
    tpu.vector_store %arg10[%c0_29, %c0_30], %152 {strides = array<i32>} : memref<18x512xf32, #tpu.memory_space<vmem>>, vector<18x512xf32>,
    %c0_31 = arith.constant 0 : index
    %c0_32 = arith.constant 0 : index
    %154 = vector.load %arg8[%c0_31, %c0_32] : memref<9x144xf32, #tpu.memory_space<vmem>>, vector<9x144xf32>
    %cst_33 = arith.constant dense<0.000000e+00> : vector<9x512xf32>
    %155 = tpu.matmul %154, %147, %cst_33 {dimension_numbers = #tpu.dot_dimension_numbers<[1], [0], [0], [1], [0, 0, 1, 1], [], []>} : vector<9x144xf32>, vector<144x512xf32>, vector<9x512xf32> -> vector<9x512xf32>
    %c0_34 = arith.constant 0 : index
    %c0_35 = arith.constant 0 : index
    %156 = vector.load %arg9[%c0_34, %c0_35] : memref<9x1xf32, #tpu.memory_space<vmem>>, vector<9x1xf32>
    %157 = vector.broadcast %156 : vector<9x1xf32> to vector<9x512xf32>
    %158 = arith.addf %155, %157 : vector<9x512xf32>
    %cst_36 = arith.constant 0.000000e+00 : f32
    %159 = vector.broadcast %cst_36 : f32 to vector<9x512xf32>
    %160 = arith.subf %159, %158 : vector<9x512xf32>
    %161 = math.exp %160 : vector<9x512xf32>
    %cst_37 = arith.constant 1.000000e+00 : f32
    %162 = vector.broadcast %cst_37 : f32 to vector<9x512xf32>
    %163 = arith.addf %162, %161 : vector<9x512xf32>
    %164 = tpu.reciprocal %163 {approx = true} : vector<9x512xf32> -> vector<9x512xf32>
    %c0_38 = arith.constant 0 : index
    %c0_39 = arith.constant 0 : index
    %165 = vector.load %arg11[%c0_38, %c0_39] : memref<9x512xf32, #tpu.memory_space<vmem>>, vector<9x512xf32>
    tpu.vector_store %arg11[%c0_38, %c0_39], %164 {strides = array<i32>} : memref<9x512xf32, #tpu.memory_space<vmem>>, vector<9x512xf32>,
    return
  }
}

</mosaic_0001>

<bundles_post_ra>
// kernel: tpu_custom_call.1
= control target key start
LH: loop header
LB: loop body
LE: loop exit
PB: predicated region body
PF: predicated region fallthrough
CT: control target
= control target key end

     0   :  { %17 = vsyncpa [#allocation3], 0  ;;  %s3075_s0 = inlined_call_operand.vmem [shape: f32[16,512], index: 0, kind: input, shape index: {}]   ;;  %s3076_s1 = inlined_call_operand.hbm [shape: f32[9,512], index: 1, kind: input, shape index: {}]   ;;  %s3077_s2 = inlined_call_operand.hbm [shape: bf16[16,144], index: 2, kind: input, shape index: {}]   ;;  %s3078_s3 = inlined_call_operand.vmem [shape: f32[16,1], index: 3, kind: input, shape index: {}]   ;;  %s3079_s4 = inlined_call_operand.vmem [shape: f32[16,1], index: 4, kind: input, shape index: {}]   ;;  %s3080_s5 = inlined_call_operand.vmem [shape: f32[16,1], index: 5, kind: input, shape index: {}]   ;;  %s3081_s6 = inlined_call_operand.vmem [shape: f32[18,144], index: 6, kind: input, shape index: {}]   ;;  %s3082_s7 = inlined_call_operand.vmem [shape: f32[18,1], index: 7, kind: input, shape index: {}]   ;;  %s3083_s8 = inlined_call_operand.hbm [shape: f32[9,144], index: 8, kind: input, shape index: {}]   ;;  %s3084_s9 = inlined_call_operand.vmem [shape: f32[9,1], index: 9, kind: input, shape index: {}]   ;;  %s3085_s10 = inlined_call_operand.hbm [shape: f32[18,512], index: 10, kind: output, shape index: {0}]   ;;  %s3086_s11 = inlined_call_operand.hbm [shape: f32[9,512], index: 11, kind: output, shape index: {1}]  }
   0x1   :  { %18 = vsyncpa [#allocation6], 0 }
   0x2   :  { %19 = vsyncpa [#allocation4], 0 }
   0x3   :  { %20 = vsyncpa [#allocation10], 0  ;;  %s1833_s17 = smov [#allocation5]   ;;  %s1715_s21 = scalar_lea.hbm %s3077_s2, 256 }
   0x4   :  { %s40_s18 = sshll.u32 %s1833_s17, 4  ;;  %p1716_p0 = scmp.ne.s32.totalorder %s3077_s2, %s1715_s21  ;;  %s41_s18 = int_to_ptr.vmem [resolvable:$true] %s40_s18 }
   0x5   :  { %p1719_p1 = scmp.lt.u32.totalorder %s1715_s21, %s3077_s2 }
   0x7   :  { %p1721_p2 = pnand %p1719_p1, %p1716_p0 }
   0x9   :  { %1724 = shalt.err (!%p1721_p2)
}
   0xa   :  { %s1725_s26 = scalar_lea.vmem %s41_s18, 256  ;;  %p1730_p4 = scmp.lt.s32.totalorder %s41_s18, %s41_s18 }
   0xb   :  { %p1726_p3 = scmp.ne.s32.totalorder %s41_s18, %s1725_s26  ;;  %p1731_p5 = scmp.lt.s32.totalorder %s1725_s26, %s1725_s26 }
   0xd   :  { %p1732_p6 = por %p1731_p5, %p1730_p4 }
   0xf   :  { %p1733_p7 = pnand %p1732_p6, %p1726_p3 }
  0x11   :  { %1736 = shalt.err (!%p1733_p7)
}
  0x12   :  { %s1834_s27 = smov 128   ;;  %s1835_s28 = smov 8  }
  0x13   :  { %46 = dma.hbm_to_vmem [thread:$0]  %s3077_s2, 256, %s41_s18, [#allocation6], %s1834_s27, %s1834_s27, %s1835_s28  }
  0x14   :  { %s1836_s12 = smov [#allocation2]   ;;  %s1737_s16 = scalar_lea.hbm %s3076_s1, 1024 }
  0x15   :  { %s28_s13 = sshll.u32 %s1836_s12, 4  ;;  %p1738_p8 = scmp.ne.s32.totalorder %s3076_s1, %s1737_s16  ;;  %s29_s13 = int_to_ptr.vmem [resolvable:$true] %s28_s13 }
  0x16   :  { %p1741_p9 = scmp.lt.u32.totalorder %s1737_s16, %s3076_s1 }
  0x18   :  { %p1743_p10 = pnand %p1741_p9, %p1738_p8 }
  0x1a   :  { %1746 = shalt.err (!%p1743_p10)
}
  0x1b   :  { %s1747_s22 = scalar_lea.vmem %s29_s13, 1024  ;;  %p1752_p12 = scmp.lt.s32.totalorder %s29_s13, %s29_s13 }
  0x1c   :  { %p1748_p11 = scmp.ne.s32.totalorder %s29_s13, %s1747_s22  ;;  %p1753_p13 = scmp.lt.s32.totalorder %s1747_s22, %s1747_s22 }
  0x1e   :  { %p1754_p0 = por %p1753_p13, %p1752_p12 }
  0x20   :  { %p1755_p1 = pnand %p1754_p0, %p1748_p11 }
  0x22   :  { %1758 = shalt.err (!%p1755_p1)
}
  0x23   :  { %s1837_s2 = smov 512   ;;  %s1838_s18 = smov 32  }
  0x24   :  { %34 = dma.hbm_to_vmem [thread:$0]  %s3076_s1, 1024, %s29_s13, [#allocation3], %s1837_s2, %s1837_s2, %s1838_s18  }
  0x25   :  { %s1839_s25 = smov [#allocation7]   ;;  %s1759_s29 = scalar_lea.hbm %s3083_s8, 512 }
  0x26   :  { %s62_s26 = sshll.u32 %s1839_s25, 4  ;;  %p1760_p2 = scmp.ne.s32.totalorder %s3083_s8, %s1759_s29  ;;  %s63_s26 = int_to_ptr.vmem [resolvable:$true] %s62_s26 }
  0x27   :  { %p1763_p3 = scmp.lt.u32.totalorder %s1759_s29, %s3083_s8 }
  0x29   :  { %p1765_p4 = pnand %p1763_p3, %p1760_p2 }
  0x2b   :  { %1768 = shalt.err (!%p1765_p4)
}
  0x2c   :  { %s1769_s16 = scalar_lea.vmem %s63_s26, 512  ;;  %p1774_p6 = scmp.lt.s32.totalorder %s63_s26, %s63_s26 }
  0x2d   :  { %p1770_p5 = scmp.ne.s32.totalorder %s63_s26, %s1769_s16  ;;  %p1775_p7 = scmp.lt.s32.totalorder %s1769_s16, %s1769_s16 }
  0x2f   :  { %p1776_p8 = por %p1775_p7, %p1774_p6 }
  0x31   :  { %p1777_p9 = pnand %p1776_p8, %p1770_p5 }
  0x33   :  { %1780 = shalt.err (!%p1777_p9)
}
  0x34   :  { %s1840_s1 = smov 256   ;;  %s1841_s13 = smov 16  }
  0x35   :  { %68 = dma.hbm_to_vmem [thread:$0]  %s3083_s8, 512, %s63_s26, [#allocation6], %s1840_s1, %s1840_s1, %s1841_s13  }
  0x36   :  { %1825 = dma.done.wait [#allocation3], 1024  }
  0x37   :  { %1826 = vsyncadd [#allocation3], 4294966272 }
  0x38   :  { %1827 = dma.done.wait [#allocation6], 768  }
  0x39   :  { %1828 = vsyncadd [#allocation6], 4294966528  ;;  %v1955_v0 = vld [vmem:[%s3075_s0 + $0x8] sm:$0xff]  ;;  %v1960_v1 = vld [vmem:[%s3075_s0] sm:$0xff]  ;;  %s1842_s24 = smov 17   ;;  %s1844_s17 = smov 1   ;;  %v113_v8 = vlaneseq }
  0x3a   :  { %101 = vrot.lane.b32.xlu1 %v1955_v0, %s1842_s24  ;;  %97 = vrot.lane.b32.xlu0 %v1960_v1, %s1842_s24  ;;  %v1969_v2 = vld [vmem:[%s3075_s0 + $0x28] sm:$0xff]  ;;  %v1974_v3 = vld [vmem:[%s3075_s0 + $0x20] sm:$0xff]  ;;  %s1845_s19 = smov 127   ;;  %s1846_s20 = smov 113   ;;  %vm574_vm0 = vcmask 130048   ;;  %v2140_v25 = vld [vmem:[#allocation2 + $0x18] sm:$0xff] }
  0x3b   :  { %v1983_v4 = vld [vmem:[%s3075_s0 + $0x38] sm:$0xff]  ;;  %v1997_v6 = vld [vmem:[%s3075_s0 + $0x30] sm:$0xff]  ;;  %s1847_s21 = smov 112   ;;  %v2104_v9 = vshrl.u32 %v113_v8, 7  ;;  %v2106_v10 = vand.u32 127, %v113_v8  ;;  %s1848_s22 = smov 111  }
  0x3c   :  { %v1988_v5 = vld [vmem:[%s3075_s0 + $0x18] sm:$0xff]  ;;  %v2002_v7 = vld [vmem:[%s3075_s0 + $0x10] sm:$0xff]  ;;  %s1843_s0 = smov 15   ;;  %v1678_v12 = vld [vmem:[#allocation5 + $0x4] ss:$8 sps:$4 sm:$0xff]   ;;  %v1849_v27 = vmov 0  }
  0x3d   :  { %v126_v11 = vsub.s32 0, %v2104_v9  ;;  %v2113_v13 = vld [vmem:[#allocation2 + $0x8] sm:$0xff]  ;;  %vm115_vm1 = vcmp.lt.s32.totalorder %v2106_v10, 17  ;;  %1499 = vmatprep.mubr.msk.bf16.mxu0 %vm574_vm0, %v1678_v12  ;;  %1500 = vmatprep.mubr.msk.bf16.mxu1 %vm574_vm0, %v1678_v12  ;;  %v2127_v18 = vld [vmem:[#allocation2] sm:$0xff]  ;;  %v2142_v26 = vld [vmem:[#allocation2 + $0x10] sm:$0xff]  ;;  %v179_v40 = vsub.s32 1, %v2104_v9 }
  0x3e   :  { %103 = vrot.lane.b32.xlu1 %v1969_v2, %s1842_s24  ;;  %99 = vrot.lane.b32.xlu0 %v1974_v3, %s1842_s24  ;;  %v554_v41 = vld [vmem:[%s3078_s3 + $0x8] sm:$0xff]  ;;  %v553_v42 = vld [vmem:[%s3078_s3] sm:$0xff]  ;;  %vm168_vm2 = vcmp.lt.s32.totalorder %v2106_v10, 16  ;;  %vm221_vm3 = vcmp.lt.s32.totalorder %v2106_v10, 15  ;;  %vm274_vm4 = vcmp.lt.s32.totalorder %v2106_v10, 1  ;;  %vm355_vm5 = vcmp.lt.s32.totalorder %v2106_v10, 127 }
  0x3f   :  { %v2123_v16 = vrot.slane %v2113_v13, %v126_v11  ;;  %v2138_v24 = vrot.slane %v2127_v18, %v126_v11  ;;  %1675 = vset.pattern.permute.xlu1 %v1849_v27  ;;  %1674 = vset.pattern.permute.xlu0 %v1849_v27  ;;  %v2149_v33 = vrot.slane %v2140_v25, %v126_v11  ;;  %v665_v55 = vld [vmem:[%s3079_s4 + $0x8] sm:$0xff]  ;;  %v664_v56 = vld [vmem:[%s3079_s4] sm:$0xff]  ;;  %vm408_vm6 = vcmp.lt.s32.totalorder %v2106_v10, 113 }
  0x40   :  { %v2158_v36 = vrot.slane %v2142_v26, %v126_v11  ;;  %v2187_v57 = vrot.slane %v2113_v13, %v179_v40  ;;  %v666_v60 = vld [vmem:[%s3080_s5] sm:$0xff]  ;;  %v667_v63 = vld [vmem:[%s3080_s5 + $0x8] sm:$0xff]  ;;  %v2202_v12 = vrot.slane %v2127_v18, %v179_v40  ;;  %v2214_v27 = vrot.slane %v2140_v25, %v179_v40 }
  0x41   :  { %vm461_vm7 = vcmp.lt.s32.totalorder %v2106_v10, 112  ;;  %vm514_vm8 = vcmp.lt.s32.totalorder %v2106_v10, 111  ;;  %v1027_v10 = vld [vmem:[%s3081_s6 + $0x18] sm:$0xff] }
  0x42   :  { %111 = vrot.lane.b32.xlu1 %v1983_v4, %s1842_s24  ;;  %109 = vrot.lane.b32.xlu0 %v1988_v5, %s1842_s24 }
  0x46   :  { %107 = vrot.lane.b32.xlu1 %v1997_v6, %s1842_s24  ;;  %105 = vrot.lane.b32.xlu0 %v2002_v7, %s1842_s24 }
  0x4a   :  { %154 = vrot.lane.b32.xlu1 %v1974_v3, %s1841_s13  ;;  %152 = vrot.lane.b32.xlu0 %v1960_v1, %s1841_s13 }
  0x4e   :  { %158 = vrot.lane.b32.xlu1 %v1969_v2, %s1841_s13  ;;  %156 = vrot.lane.b32.xlu0 %v1955_v0, %s1841_s13 }
  0x52   :  { %166 = vrot.lane.b32.xlu1 %v1983_v4, %s1841_s13  ;;  %164 = vrot.lane.b32.xlu0 %v1988_v5, %s1841_s13 }
  0x56   :  { %162 = vrot.lane.b32.xlu1 %v1997_v6, %s1841_s13  ;;  %160 = vrot.lane.b32.xlu0 %v2002_v7, %s1841_s13 }
  0x5a   :  { %207 = vrot.lane.b32.xlu1 %v1974_v3, %s1843_s0  ;;  %205 = vrot.lane.b32.xlu0 %v1960_v1, %s1843_s0 }
  0x5e   :  { %211 = vrot.lane.b32.xlu1 %v1969_v2, %s1843_s0  ;;  %209 = vrot.lane.b32.xlu0 %v1955_v0, %s1843_s0 }
  0x62   :  { %219 = vrot.lane.b32.xlu1 %v1983_v4, %s1843_s0  ;;  %217 = vrot.lane.b32.xlu0 %v1988_v5, %s1843_s0 }
  0x66   :  { %215 = vrot.lane.b32.xlu1 %v1997_v6, %s1843_s0  ;;  %213 = vrot.lane.b32.xlu0 %v2002_v7, %s1843_s0 }
  0x6a   :  { %260 = vrot.lane.b32.xlu1 %v1974_v3, %s1844_s17  ;;  %258 = vrot.lane.b32.xlu0 %v1960_v1, %s1844_s17 }
  0x6e   :  { %264 = vrot.lane.b32.xlu1 %v1969_v2, %s1844_s17  ;;  %262 = vrot.lane.b32.xlu0 %v1955_v0, %s1844_s17 }
  0x72   :  { %272 = vrot.lane.b32.xlu1 %v1983_v4, %s1844_s17  ;;  %270 = vrot.lane.b32.xlu0 %v1988_v5, %s1844_s17 }
  0x76   :  { %268 = vrot.lane.b32.xlu1 %v1997_v6, %s1844_s17  ;;  %266 = vrot.lane.b32.xlu0 %v2002_v7, %s1844_s17 }
  0x7a   :  { %345 = vrot.lane.b32.xlu1 %v1969_v2, %s1845_s19  ;;  %343 = vrot.lane.b32.xlu0 %v1955_v0, %s1845_s19 }
  0x7e   :  { %349 = vrot.lane.b32.xlu1 %v1997_v6, %s1845_s19  ;;  %347 = vrot.lane.b32.xlu0 %v2002_v7, %s1845_s19 }
  0x82   :  { %341 = vrot.lane.b32.xlu1 %v1974_v3, %s1845_s19  ;;  %339 = vrot.lane.b32.xlu0 %v1960_v1, %s1845_s19 }
  0x86   :  { %353 = vrot.lane.b32.xlu1 %v1983_v4, %s1845_s19  ;;  %351 = vrot.lane.b32.xlu0 %v1988_v5, %s1845_s19 }
  0x8a   :  { %398 = vrot.lane.b32.xlu1 %v1969_v2, %s1846_s20  ;;  %396 = vrot.lane.b32.xlu0 %v1955_v0, %s1846_s20 }
  0x8e   :  { %402 = vrot.lane.b32.xlu1 %v1997_v6, %s1846_s20  ;;  %400 = vrot.lane.b32.xlu0 %v2002_v7, %s1846_s20 }
  0x92   :  { %394 = vrot.lane.b32.xlu1 %v1974_v3, %s1846_s20  ;;  %392 = vrot.lane.b32.xlu0 %v1960_v1, %s1846_s20 }
  0x96   :  { %406 = vrot.lane.b32.xlu1 %v1983_v4, %s1846_s20  ;;  %404 = vrot.lane.b32.xlu0 %v1988_v5, %s1846_s20 }
  0x9a   :  { %451 = vrot.lane.b32.xlu1 %v1969_v2, %s1847_s21  ;;  %449 = vrot.lane.b32.xlu0 %v1955_v0, %s1847_s21 }
  0x9e   :  { %455 = vrot.lane.b32.xlu1 %v1997_v6, %s1847_s21  ;;  %453 = vrot.lane.b32.xlu0 %v2002_v7, %s1847_s21 }
  0xa2   :  { %447 = vrot.lane.b32.xlu1 %v1974_v3, %s1847_s21  ;;  %445 = vrot.lane.b32.xlu0 %v1960_v1, %s1847_s21 }
  0xa6   :  { %459 = vrot.lane.b32.xlu1 %v1983_v4, %s1847_s21  ;;  %457 = vrot.lane.b32.xlu0 %v1988_v5, %s1847_s21 }
  0xaa   :  { %504 = vrot.lane.b32.xlu1 %v1969_v2, %s1848_s22  ;;  %502 = vrot.lane.b32.xlu0 %v1955_v0, %s1848_s22 }
  0xac   :  { %v102_v14 = vpop.permute.xlu1 %101  ;;  %v98_v15 = vpop.permute.xlu0 %97 }
  0xad   :  { %v120_v17 = vsel %vm115_vm1, %v98_v15, %v102_v14 }
  0xae   :  { %508 = vrot.lane.b32.xlu1 %v1997_v6, %s1848_s22  ;;  %506 = vrot.lane.b32.xlu0 %v2002_v7, %s1848_s22  ;;  %v141_v22 = vmul.f32 %v2123_v16, %v120_v17 }
  0xb0   :  { %v104_v19 = vpop.permute.xlu1 %103  ;;  %v100_v20 = vpop.permute.xlu0 %99 }
  0xb1   :  { %v121_v21 = vsel %vm115_vm1, %v100_v20, %v104_v19 }
  0xb2   :  { %500 = vrot.lane.b32.xlu1 %v1974_v3, %s1848_s22  ;;  %498 = vrot.lane.b32.xlu0 %v1960_v1, %s1848_s22  ;;  %v145_v23 = vmul.f32 %v2123_v16, %v121_v21 }
  0xb4   :  { %v112_v28 = vpop.permute.xlu1 %111  ;;  %v110_v29 = vpop.permute.xlu0 %109  ;;  %v149_v30 = vpack.c.bf16 %v145_v23, %v141_v22  ;;  %v2211_v23 = vrot.slane %v2142_v26, %v179_v40 }
  0xb5   :  { %v123_v31 = vsel %vm115_vm1, %v112_v28, %v100_v20  ;;  %v122_v32 = vsel %vm115_vm1, %v110_v29, %v98_v15 }
  0xb6   :  { %512 = vrot.lane.b32.xlu1 %v1983_v4, %s1848_s22  ;;  %510 = vrot.lane.b32.xlu0 %v1988_v5, %s1848_s22  ;;  %v140_v34 = vmul.f32 %v2138_v24, %v122_v32  ;;  %v144_v35 = vmul.f32 %v2138_v24, %v123_v31  ;;  %v232_v31 = vsub.s32 2, %v2104_v9 }
  0xb7   :  { %578 = vmatprep.subr.bf16.mxu0 %v149_v30 }
  0xb8   :  { %v108_v37 = vpop.permute.xlu1 %107  ;;  %v106_v38 = vpop.permute.xlu0 %105  ;;  %v148_v39 = vpack.c.bf16 %v144_v35, %v140_v34 }
  0xb9   :  { %v119_v43 = vsel %vm115_vm1, %v104_v19, %v108_v37  ;;  %v118_v44 = vsel %vm115_vm1, %v102_v14, %v106_v38  ;;  %v116_v45 = vsel %vm115_vm1, %v106_v38, %v110_v29  ;;  %v117_v46 = vsel %vm115_vm1, %v108_v37, %v112_v28 }
  0xba   :  { %579 = vmatpush1.bf16.msra.mxu0 %v148_v39  ;;  %v143_v47 = vmul.f32 %v2149_v33, %v116_v45  ;;  %v147_v48 = vmul.f32 %v2149_v33, %v117_v46  ;;  %v142_v49 = vmul.f32 %v2158_v36, %v118_v44  ;;  %v146_v50 = vmul.f32 %v2158_v36, %v119_v43 }
  0xbb   :  { %562 = vperm.xlu1 %1675, %v554_v41   ;;  %557 = vperm.xlu0 %1674, %v553_v42   ;;  %v2231_v46 = vrot.slane %v2113_v13, %v232_v31 }
  0xbc   :  { %v155_v51 = vpop.permute.xlu1 %154  ;;  %v153_v52 = vpop.permute.xlu0 %152  ;;  %v151_v53 = vpack.c.bf16 %v147_v48, %v143_v47  ;;  %v150_v54 = vpack.c.bf16 %v146_v50, %v142_v49 }
  0xbe   :  { %621 = vmatprep.subr.bf16.mxu1 %v151_v53  ;;  %v2240_v53 = vrot.slane %v2127_v18, %v232_v31 }
  0xbf   :  { %622 = vmatpush1.bf16.msra.mxu1 %v150_v54  ;;  %731 = vperm.xlu1 %1675, %v665_v55  }
  0xc0   :  { %v159_v58 = vpop.permute.xlu1 %158  ;;  %v157_v59 = vpop.permute.xlu0 %156  ;;  %726 = vperm.xlu0 %1674, %v664_v56  }
  0xc1   :  { %v174_v61 = vsel %vm168_vm2, %v155_v51, %v159_v58  ;;  %v173_v62 = vsel %vm168_vm2, %v153_v52, %v157_v59 }
  0xc2   :  { %v198_v8 = vmul.f32 %v2187_v57, %v174_v61  ;;  %v194_v11 = vmul.f32 %v2187_v57, %v173_v62  ;;  %v2249_v62 = vrot.slane %v2142_v26, %v232_v31 }
  0xc3   :  { %744 = vperm.xlu1 %1675, %v666_v60  }
  0xc4   :  { %v167_v14 = vpop.permute.xlu1 %166  ;;  %v165_v15 = vpop.permute.xlu0 %164  ;;  %v202_v17 = vpack.c.bf16 %v198_v8, %v194_v11  ;;  %749 = vperm.xlu0 %1674, %v667_v63   ;;  %v2252_v63 = vrot.slane %v2140_v25, %v232_v31  ;;  %v313_v31 = vsub.s32 4, %v2104_v9 }
  0xc5   :  { %v176_v19 = vsel %vm168_vm2, %v167_v14, %v155_v51  ;;  %v175_v20 = vsel %vm168_vm2, %v165_v15, %v153_v52 }
  0xc6   :  { %v197_v21 = vmul.f32 %v2202_v12, %v176_v19  ;;  %v193_v22 = vmul.f32 %v2202_v12, %v175_v20  ;;  %580 = vmatprep.subr.bf16.mxu0 %v202_v17 }
  0xc8   :  { %v163_v28 = vpop.permute.xlu1 %162  ;;  %v161_v29 = vpop.permute.xlu0 %160  ;;  %v201_v30 = vpack.c.bf16 %v197_v21, %v193_v22 }
  0xc9   :  { %v170_v32 = vsel %vm168_vm2, %v163_v28, %v167_v14  ;;  %v172_v34 = vsel %vm168_vm2, %v159_v58, %v163_v28  ;;  %v169_v35 = vsel %vm168_vm2, %v161_v29, %v165_v15  ;;  %v171_v37 = vsel %vm168_vm2, %v157_v59, %v161_v29 }
  0xca   :  { %v199_v38 = vmul.f32 %v2211_v23, %v172_v34  ;;  %v200_v39 = vmul.f32 %v2214_v27, %v170_v32  ;;  %v195_v40 = vmul.f32 %v2211_v23, %v171_v37  ;;  %v196_v41 = vmul.f32 %v2214_v27, %v169_v35  ;;  %581 = vmatpush1.bf16.msra.mxu0 %v201_v30 }
  0xcb   :  { %v285_v15 = vsub.s32 3, %v2104_v9 }
  0xcc   :  { %v208_v42 = vpop.permute.xlu1 %207  ;;  %v206_v43 = vpop.permute.xlu0 %205  ;;  %v204_v44 = vpack.c.bf16 %v200_v39, %v196_v41  ;;  %v203_v45 = vpack.c.bf16 %v199_v38, %v195_v40  ;;  %v2273_v39 = vrot.slane %v2113_v13, %v313_v31 }
  0xcd   :  { %v2270_v38 = vrot.slane %v2113_v13, %v285_v15 }
  0xce   :  { %623 = vmatprep.subr.bf16.mxu1 %v204_v44 }
  0xcf   :  { %624 = vmatpush1.bf16.msra.mxu1 %v203_v45 }
  0xd0   :  { %v212_v47 = vpop.permute.xlu1 %211  ;;  %v210_v48 = vpop.permute.xlu0 %209 }
  0xd1   :  { %v227_v49 = vsel %vm221_vm3, %v208_v42, %v212_v47  ;;  %v226_v50 = vsel %vm221_vm3, %v206_v43, %v210_v48 }
  0xd2   :  { %v251_v51 = vmul.f32 %v2231_v46, %v227_v49  ;;  %v247_v52 = vmul.f32 %v2231_v46, %v226_v50  ;;  %v328_v49 = vmul.f32 %v2273_v39, %v1955_v0  ;;  %v332_v50 = vmul.f32 %v2273_v39, %v1969_v2 }
  0xd4   :  { %v220_v54 = vpop.permute.xlu1 %219  ;;  %v218_v55 = vpop.permute.xlu0 %217  ;;  %v255_v56 = vpack.c.bf16 %v251_v51, %v247_v52 }
  0xd5   :  { %v229_v58 = vsel %vm221_vm3, %v220_v54, %v208_v42  ;;  %v228_v59 = vsel %vm221_vm3, %v218_v55, %v206_v43  ;;  %v2276_v42 = vrot.slane %v2127_v18, %v313_v31 }
  0xd6   :  { %v250_v60 = vmul.f32 %v2240_v53, %v229_v58  ;;  %v246_v61 = vmul.f32 %v2240_v53, %v228_v59  ;;  %582 = vmatprep.subr.bf16.mxu0 %v255_v56  ;;  %v2296_v58 = vrot.slane %v2140_v25, %v313_v31 }
  0xd7   :  { %v331_v56 = vmul.f32 %v2276_v42, %v1974_v3  ;;  %v366_v3 = vsub.s32 5, %v2104_v9 }
  0xd8   :  { %v216_v8 = vpop.permute.xlu1 %215  ;;  %v214_v11 = vpop.permute.xlu0 %213  ;;  %v254_v14 = vpack.c.bf16 %v250_v60, %v246_v61  ;;  %v2305_v61 = vrot.slane %v2142_v26, %v285_v15 }
  0xd9   :  { %v223_v17 = vsel %vm221_vm3, %v216_v8, %v220_v54  ;;  %v225_v19 = vsel %vm221_vm3, %v212_v47, %v216_v8  ;;  %v222_v20 = vsel %vm221_vm3, %v214_v11, %v218_v55  ;;  %v224_v21 = vsel %vm221_vm3, %v210_v48, %v214_v11 }
  0xda   :  { %v252_v22 = vmul.f32 %v2249_v62, %v225_v19  ;;  %v253_v28 = vmul.f32 %v2252_v63, %v223_v17  ;;  %v248_v29 = vmul.f32 %v2249_v62, %v224_v21  ;;  %v249_v30 = vmul.f32 %v2252_v63, %v222_v20  ;;  %583 = vmatpush1.bf16.msra.mxu0 %v254_v14 }
  0xdb   :  { %v2285_v48 = vrot.slane %v2127_v18, %v285_v15  ;;  %v327_v55 = vmul.f32 %v2276_v42, %v1960_v1  ;;  %v2308_v1 = vrot.slane %v2140_v25, %v285_v15  ;;  %v336_v8 = vpack.c.bf16 %v332_v50, %v328_v49 }
  0xdc   :  { %v261_v32 = vpop.permute.xlu1 %260  ;;  %v259_v34 = vpop.permute.xlu0 %258  ;;  %v257_v35 = vpack.c.bf16 %v253_v28, %v249_v30  ;;  %v256_v37 = vpack.c.bf16 %v252_v22, %v248_v29  ;;  %v2312_v11 = vrot.slane %v2142_v26, %v313_v31  ;;  %v330_v21 = vmul.f32 %v2296_v58, %v1988_v5 }
  0xdd   :  { %v335_v20 = vpack.c.bf16 %v331_v56, %v327_v55  ;;  %v334_v22 = vmul.f32 %v2296_v58, %v1983_v4 }
  0xde   :  { %625 = vmatprep.subr.bf16.mxu1 %v257_v35  ;;  %v333_v35 = vmul.f32 %v2312_v11, %v1997_v6 }
  0xdf   :  { %626 = vmatpush1.bf16.msra.mxu1 %v256_v37 }
  0xe0   :  { %v265_v40 = vpop.permute.xlu1 %264  ;;  %v263_v41 = vpop.permute.xlu0 %262 }
  0xe1   :  { %v280_v43 = vsel %vm274_vm4, %v261_v32, %v265_v40  ;;  %v279_v44 = vsel %vm274_vm4, %v259_v34, %v263_v41 }
  0xe2   :  { %v304_v45 = vmul.f32 %v2270_v38, %v280_v43  ;;  %v300_v47 = vmul.f32 %v2270_v38, %v279_v44  ;;  %v338_v44 = vpack.c.bf16 %v334_v22, %v330_v21  ;;  %v419_v22 = vsub.s32 6, %v2104_v9 }
  0xe4   :  { %v273_v51 = vpop.permute.xlu1 %272  ;;  %v271_v52 = vpop.permute.xlu0 %270  ;;  %v308_v54 = vpack.c.bf16 %v304_v45, %v300_v47  ;;  %v2336_v45 = vrot.slane %v2113_v13, %v366_v3 }
  0xe5   :  { %v282_v59 = vsel %vm274_vm4, %v273_v51, %v261_v32  ;;  %v281_v0 = vsel %vm274_vm4, %v271_v52, %v259_v34  ;;  %v329_v34 = vmul.f32 %v2312_v11, %v2002_v7 }
  0xe6   :  { %v303_v2 = vmul.f32 %v2285_v48, %v282_v59  ;;  %v299_v60 = vmul.f32 %v2285_v48, %v281_v0  ;;  %584 = vmatprep.subr.bf16.mxu0 %v308_v54  ;;  %v2345_v54 = vrot.slane %v2127_v18, %v366_v3 }
  0xe7   :  { %v337_v47 = vpack.c.bf16 %v333_v35, %v329_v34 }
  0xe8   :  { %v269_v14 = vpop.permute.xlu1 %268  ;;  %v267_v17 = vpop.permute.xlu0 %266  ;;  %v307_v19 = vpack.c.bf16 %v303_v2, %v299_v60 }
  0xe9   :  { %v276_v15 = vsel %vm274_vm4, %v269_v14, %v273_v51  ;;  %v278_v28 = vsel %vm274_vm4, %v265_v40, %v269_v14  ;;  %v275_v29 = vsel %vm274_vm4, %v267_v17, %v271_v52  ;;  %v277_v30 = vsel %vm274_vm4, %v263_v41, %v267_v17 }
  0xea   :  { %v305_v31 = vmul.f32 %v2305_v61, %v278_v28  ;;  %v306_v32 = vmul.f32 %v2308_v1, %v276_v15  ;;  %v301_v5 = vmul.f32 %v2305_v61, %v277_v30  ;;  %v302_v4 = vmul.f32 %v2308_v1, %v275_v29  ;;  %585 = vmatpush1.bf16.msra.mxu0 %v307_v19 }
  0xeb   :  { %586 = vmatprep.subr.bf16.mxu0 %v336_v8  ;;  %v2354_v14 = vrot.slane %v2142_v26, %v366_v3  ;;  %v2357_v17 = vrot.slane %v2140_v25, %v366_v3 }
  0xec   :  { %v346_v37 = vpop.permute.xlu1 %345  ;;  %v344_v40 = vpop.permute.xlu0 %343  ;;  %v310_v43 = vpack.c.bf16 %v306_v32, %v302_v4  ;;  %v309_v41 = vpack.c.bf16 %v305_v31, %v301_v5 }
  0xee   :  { %627 = vmatprep.subr.bf16.mxu1 %v310_v43  ;;  %587 = vmatpush1.bf16.msra.mxu0 %v335_v20 }
  0xef   :  { %628 = vmatpush1.bf16.msra.mxu1 %v309_v41 }
  0xf0   :  { %v350_v49 = vpop.permute.xlu1 %349  ;;  %v348_v50 = vpop.permute.xlu0 %347  ;;  %629 = vmatprep.subr.bf16.mxu1 %v338_v44 }
  0xf1   :  { %v359_v6 = vsel %vm355_vm5, %v346_v37, %v350_v49  ;;  %v358_v7 = vsel %vm355_vm5, %v344_v40, %v348_v50 }
  0xf2   :  { %v385_v51 = vmul.f32 %v2336_v45, %v359_v6  ;;  %v381_v52 = vmul.f32 %v2336_v45, %v358_v7  ;;  %v2383_v6 = vrot.slane %v2127_v18, %v419_v22 }
  0xf3   :  { %630 = vmatpush1.bf16.msra.mxu1 %v337_v47 }
  0xf4   :  { %v342_v55 = vpop.permute.xlu1 %341  ;;  %v340_v56 = vpop.permute.xlu0 %339  ;;  %v389_v59 = vpack.c.bf16 %v385_v51, %v381_v52 }
  0xf5   :  { %v361_v0 = vsel %vm355_vm5, %v342_v55, %v346_v37  ;;  %v360_v2 = vsel %vm355_vm5, %v340_v56, %v344_v40  ;;  %v2374_v40 = vrot.slane %v2113_v13, %v419_v22 }
  0xf6   :  { %v384_v60 = vmul.f32 %v2345_v54, %v361_v0  ;;  %v380_v8 = vmul.f32 %v2345_v54, %v360_v2  ;;  %588 = vmatprep.subr.bf16.mxu0 %v389_v59  ;;  %v2392_v2 = vrot.slane %v2142_v26, %v419_v22 }
  0xf8   :  { %v354_v19 = vpop.permute.xlu1 %353  ;;  %v352_v20 = vpop.permute.xlu0 %351  ;;  %v388_v21 = vpack.c.bf16 %v384_v60, %v380_v8  ;;  %v2395_v60 = vrot.slane %v2140_v25, %v419_v22 }
  0xf9   :  { %v357_v15 = vsel %vm355_vm5, %v350_v49, %v354_v19  ;;  %v363_v28 = vsel %vm355_vm5, %v354_v19, %v342_v55  ;;  %v356_v29 = vsel %vm355_vm5, %v348_v50, %v352_v20  ;;  %v362_v30 = vsel %vm355_vm5, %v352_v20, %v340_v56 }
  0xfa   :  { %v386_v3 = vmul.f32 %v2354_v14, %v357_v15  ;;  %v387_v31 = vmul.f32 %v2357_v17, %v363_v28  ;;  %v382_v32 = vmul.f32 %v2354_v14, %v356_v29  ;;  %v383_v5 = vmul.f32 %v2357_v17, %v362_v30  ;;  %589 = vmatpush1.bf16.msra.mxu0 %v388_v21 }
  0xfb   :  { %v472_v21 = vsub.s32 7, %v2104_v9 }
  0xfc   :  { %v399_v4 = vpop.permute.xlu1 %398  ;;  %v397_v34 = vpop.permute.xlu0 %396  ;;  %v391_v35 = vpack.c.bf16 %v387_v31, %v383_v5  ;;  %v390_v37 = vpack.c.bf16 %v386_v3, %v382_v32 }
  0xfe   :  { %631 = vmatprep.subr.bf16.mxu1 %v391_v35  ;;  %v2412_v35 = vrot.slane %v2113_v13, %v472_v21 }
  0xff   :  { %632 = vmatpush1.bf16.msra.mxu1 %v390_v37 }
 0x100   :  { %v403_v43 = vpop.permute.xlu1 %402  ;;  %v401_v41 = vpop.permute.xlu0 %400  ;;  %3101 = vst [vmem:[#allocation15_spill] sm:$0xff] %v2412_v35 }
 0x101   :  { %v412_v44 = vsel %vm408_vm6, %v399_v4, %v403_v43  ;;  %v411_v47 = vsel %vm408_vm6, %v397_v34, %v401_v41 }
 0x102   :  { %v438_v49 = vmul.f32 %v2374_v40, %v412_v44  ;;  %v434_v50 = vmul.f32 %v2374_v40, %v411_v47 }
 0x104   :  { %v395_v7 = vpop.permute.xlu1 %394  ;;  %v393_v51 = vpop.permute.xlu0 %392  ;;  %v442_v52 = vpack.c.bf16 %v438_v49, %v434_v50  ;;  %v2421_v50 = vrot.slane %v2127_v18, %v472_v21  ;;  %v2433_v18 = vrot.slane %v2140_v25, %v472_v21 }
 0x105   :  { %v414_v55 = vsel %vm408_vm6, %v395_v7, %v399_v4  ;;  %v413_v56 = vsel %vm408_vm6, %v393_v51, %v397_v34 }
 0x106   :  { %v437_v59 = vmul.f32 %v2383_v6, %v414_v55  ;;  %v433_v0 = vmul.f32 %v2383_v6, %v413_v56  ;;  %590 = vmatprep.subr.bf16.mxu0 %v442_v52  ;;  %3103 = vst [vmem:[#allocation17_spill] sm:$0xff] %v2433_v18 }
 0x108   :  { %v407_v8 = vpop.permute.xlu1 %406  ;;  %v405_v19 = vpop.permute.xlu0 %404  ;;  %v441_v20 = vpack.c.bf16 %v437_v59, %v433_v0  ;;  %v2430_v0 = vrot.slane %v2142_v26, %v472_v21 }
 0x109   :  { %v410_v15 = vsel %vm408_vm6, %v403_v43, %v407_v8  ;;  %v416_v28 = vsel %vm408_vm6, %v407_v8, %v395_v7  ;;  %v409_v29 = vsel %vm408_vm6, %v401_v41, %v405_v19  ;;  %v415_v30 = vsel %vm408_vm6, %v405_v19, %v393_v51 }
 0x10a   :  { %v439_v22 = vmul.f32 %v2392_v2, %v410_v15  ;;  %v440_v3 = vmul.f32 %v2395_v60, %v416_v28  ;;  %v435_v31 = vmul.f32 %v2392_v2, %v409_v29  ;;  %v436_v9 = vmul.f32 %v2395_v60, %v415_v30  ;;  %591 = vmatpush1.bf16.msra.mxu0 %v441_v20 }
 0x10b   :  { %3102 = vst [vmem:[#allocation16_spill] sm:$0xff] %v2430_v0 }
 0x10c   :  { %v452_v32 = vpop.permute.xlu1 %451  ;;  %v450_v5 = vpop.permute.xlu0 %449  ;;  %v444_v4 = vpack.c.bf16 %v440_v3, %v436_v9  ;;  %v443_v34 = vpack.c.bf16 %v439_v22, %v435_v31 }
 0x10e   :  { %633 = vmatprep.subr.bf16.mxu1 %v444_v4 }
 0x10f   :  { %634 = vmatpush1.bf16.msra.mxu1 %v443_v34 }
 0x110   :  { %v456_v37 = vpop.permute.xlu1 %455  ;;  %v454_v43 = vpop.permute.xlu0 %453 }
 0x111   :  { %v465_v41 = vsel %vm461_vm7, %v452_v32, %v456_v37  ;;  %v464_v44 = vsel %vm461_vm7, %v450_v5, %v454_v43 }
 0x112   :  { %v491_v47 = vmul.f32 %v2412_v35, %v465_v41  ;;  %v487_v49 = vmul.f32 %v2412_v35, %v464_v44 }
 0x114   :  { %v448_v7 = vpop.permute.xlu1 %447  ;;  %v446_v51 = vpop.permute.xlu0 %445  ;;  %v495_v13 = vpack.c.bf16 %v491_v47, %v487_v49  ;;  %v2456_v47 = vld [vmem:[#allocation2 + $0x20] ss:$0 sm:$0xff] }
 0x115   :  { %v467_v52 = vsel %vm461_vm7, %v448_v7, %v452_v32  ;;  %v466_v55 = vsel %vm461_vm7, %v446_v51, %v450_v5  ;;  %v2448_v5 = vld [vmem:[#allocation2 + $0x28] ss:$0 sm:$0xff]  ;;  %3105 = vst [vmem:[#allocation19_spill] sm:$0xff] %v2456_v47 }
 0x116   :  { %v490_v56 = vmul.f32 %v2421_v50, %v467_v52  ;;  %v486_v59 = vmul.f32 %v2421_v50, %v466_v55  ;;  %592 = vmatprep.subr.bf16.mxu0 %v495_v13  ;;  %3104 = vst [vmem:[#allocation18_spill] sm:$0xff] %v2448_v5 }
 0x118   :  { %v460_v8 = vpop.permute.xlu1 %459  ;;  %v458_v19 = vpop.permute.xlu0 %457  ;;  %v494_v20 = vpack.c.bf16 %v490_v56, %v486_v59  ;;  %v2464_v59 = vld [vmem:[#allocation2 + $0x30] ss:$0 sm:$0xff] }
 0x119   :  { %v463_v15 = vsel %vm461_vm7, %v456_v37, %v460_v8  ;;  %v469_v28 = vsel %vm461_vm7, %v460_v8, %v448_v7  ;;  %v462_v29 = vsel %vm461_vm7, %v454_v43, %v458_v19  ;;  %v468_v30 = vsel %vm461_vm7, %v458_v19, %v446_v51  ;;  %3106 = vst [vmem:[#allocation20_spill] sm:$0xff] %v2464_v59  ;;  %v2466_v8 = vld [vmem:[#allocation2 + $0x38] ss:$0 sm:$0xff] }
 0x11a   :  { %v492_v26 = vmul.f32 %v2430_v0, %v463_v15  ;;  %v493_v25 = vmul.f32 %v2433_v18, %v469_v28  ;;  %v488_v21 = vmul.f32 %v2430_v0, %v462_v29  ;;  %v489_v22 = vmul.f32 %v2433_v18, %v468_v30  ;;  %593 = vmatpush1.bf16.msra.mxu0 %v494_v20 }
 0x11b   :  { %3107 = vst [vmem:[#allocation21_spill] sm:$0xff] %v2466_v8 }
 0x11c   :  { %v505_v3 = vpop.permute.xlu1 %504  ;;  %v503_v31 = vpop.permute.xlu0 %502  ;;  %v497_v9 = vpack.c.bf16 %v493_v25, %v489_v22  ;;  %v496_v32 = vpack.c.bf16 %v492_v26, %v488_v21  ;;  %v1676_v25 = vld [vmem:[#allocation5] ss:$8 sps:$4 sm:$0xff]  }
 0x11e   :  { %635 = vmatprep.subr.bf16.mxu1 %v497_v9 }
 0x11f   :  { %636 = vmatpush1.bf16.msra.mxu1 %v496_v32 }
 0x120   :  { %v509_v4 = vpop.permute.xlu1 %508  ;;  %v507_v34 = vpop.permute.xlu0 %506 }
 0x121   :  { %v518_v37 = vsel %vm514_vm8, %v505_v3, %v509_v4  ;;  %v517_v43 = vsel %vm514_vm8, %v503_v31, %v507_v34 }
 0x122   :  { %v544_v41 = vmul.f32 %v2448_v5, %v518_v37  ;;  %v540_v44 = vmul.f32 %v2448_v5, %v517_v43 }
 0x124   :  { %v501_v49 = vpop.permute.xlu1 %500  ;;  %v499_v7 = vpop.permute.xlu0 %498  ;;  %v548_v51 = vpack.c.bf16 %v544_v41, %v540_v44 }
 0x125   :  { %v520_v13 = vsel %vm514_vm8, %v501_v49, %v505_v3  ;;  %v519_v52 = vsel %vm514_vm8, %v499_v7, %v503_v31 }
 0x126   :  { %v543_v55 = vmul.f32 %v2456_v47, %v520_v13  ;;  %v539_v56 = vmul.f32 %v2456_v47, %v519_v52  ;;  %594 = vmatprep.subr.bf16.mxu0 %v548_v51 }
 0x128   :  { %v513_v19 = vpop.permute.xlu1 %512  ;;  %v511_v20 = vpop.permute.xlu0 %510  ;;  %v547_v15 = vpack.c.bf16 %v543_v55, %v539_v56 }
 0x129   :  { %v516_v28 = vsel %vm514_vm8, %v509_v4, %v513_v19  ;;  %v522_v29 = vsel %vm514_vm8, %v513_v19, %v501_v49  ;;  %v515_v30 = vsel %vm514_vm8, %v507_v34, %v511_v20  ;;  %v521_v26 = vsel %vm514_vm8, %v511_v20, %v499_v7 }
 0x12a   :  { %v545_v21 = vmul.f32 %v2464_v59, %v516_v28  ;;  %v546_v22 = vmul.f32 %v2466_v8, %v522_v29  ;;  %v541_v3 = vmul.f32 %v2464_v59, %v515_v30  ;;  %v542_v31 = vmul.f32 %v2466_v8, %v521_v26  ;;  %595 = vmatpush1.bf16.msra.mxu0 %v547_v15 }
 0x12c   :  { %v550_v9 = vpack.c.bf16 %v546_v22, %v542_v31  ;;  %v549_v32 = vpack.c.bf16 %v545_v21, %v541_v3 }
 0x12d   :  { %611 = vmatmul.mubr.bf16.vlgmr.msra.gmra.mrb[0].mxu0 %v1676_v25 }
 0x12e   :  { %637 = vmatprep.subr.bf16.mxu1 %v550_v9 }
 0x12f   :  { %638 = vmatpush1.bf16.msra.mxu1 %v549_v32 }
 0x132   :  { %654 = vmatmul.mubr.bf16.vlgmr.msra.gmra.mrb[0].mxu1 %v1676_v25 }
 0x13a   :  { %v558_v4 = vpop.permute.xlu0 %557  ;;  %v563_v41 = vpop.permute.xlu1 %562 }
 0x200   :  { %v612_v34 = vpop.f32.mrb[0].mxu0 }
 0x201   :  { %v2480_v37 = vadd.f32 %v612_v34, %v558_v4  ;;  %v614_v43 = vpop.f32.mrb[1].mxu0 }
 0x202   :  { %v2482_v44 = vadd.f32 %v614_v43, %v558_v4  ;;  %v616_v49 = vpop.f32.mrb[2].mxu0 }
 0x203   :  { %v617_v7 = vadd.f32 %v616_v49, %v563_v41  ;;  %v618_v51 = vpop.f32.mrb[3].mxu0  ;;  %v680_v13 = vmul.f32 %v2480_v37, %v2480_v37 }
 0x204   :  { %v668_v52 = vadd.f32 %v2482_v44, %v2480_v37  ;;  %v681_v55 = vmul.f32 %v2482_v44, %v2482_v44  ;;  %v619_v56 = vadd.f32 %v618_v51, %v563_v41 }
 0x205   :  { %v655_v19 = vpop.f32.mrb[0].mxu1  ;;  %v684_v20 = vmul.f32 %v617_v7, %v617_v7 }
 0x206   :  { %v685_v15 = vmul.f32 %v619_v56, %v619_v56  ;;  %v2490_v28 = vadd.f32 %v655_v19, %v558_v4  ;;  %v657_v29 = vpop.f32.mrb[1].mxu1  ;;  %v673_v30 = vadd.f32 %v619_v56, %v617_v7  ;;  %v688_v9 = vadd.f32 %v681_v55, %v680_v13  ;;  %v727_v55 = vpop.permute.xlu0 %726 }
 0x207   :  { %v2492_v26 = vadd.f32 %v657_v29, %v558_v4  ;;  %v659_v25 = vpop.f32.mrb[2].mxu1 }
 0x208   :  { %v682_v21 = vmul.f32 %v2490_v28, %v2490_v28  ;;  %v660_v22 = vadd.f32 %v659_v25, %v563_v41  ;;  %v661_v3 = vpop.f32.mrb[3].mxu1  ;;  %v669_v31 = vadd.f32 %v668_v52, %v2490_v28  ;;  %v693_v51 = vadd.f32 %v685_v15, %v684_v20  ;;  %v732_v52 = vpop.permute.xlu1 %731 }
 0x209   :  { %v2497_v32 = vadd.f32 %v661_v3, %v563_v41  ;;  %v683_v25 = vmul.f32 %v2492_v26, %v2492_v26 }
 0x20a   :  { %v686_v34 = vmul.f32 %v660_v22, %v660_v22  ;;  %v670_v43 = vadd.f32 %v669_v31, %v2492_v26  ;;  %v674_v49 = vadd.f32 %v673_v30, %v660_v22  ;;  %v689_v8 = vadd.f32 %v688_v9, %v682_v21  ;;  %v750_v20 = vpop.permute.xlu0 %749 }
 0x20b   :  { %v687_v4 = vmul.f32 %v2497_v32, %v2497_v32 }
 0x20c   :  { %671 = vadd.xlane.f32.xlu1 %v670_v43  ;;  %v675_v19 = vadd.f32 %v674_v49, %v2497_v32  ;;  %v694_v29 = vadd.f32 %v693_v51, %v686_v34  ;;  %v690_v41 = vadd.f32 %v689_v8, %v683_v25  ;;  %v745_v30 = vpop.permute.xlu1 %744 }
 0x20e   :  { %676 = vadd.xlane.f32.xlu0 %v675_v19  ;;  %v695_v13 = vadd.f32 %v694_v29, %v687_v4 }
 0x210   :  { %696 = vadd.xlane.f32.xlu1 %v695_v13 }
 0x212   :  { %691 = vadd.xlane.f32.xlu0 %v690_v41 }
 0x299   :  { %v672_v15 = vpop.xlane.xlu1 %671 }
 0x29a   :  { %v678_v31 = vmul.f32 0.001953125, %v672_v15 }
 0x29b   :  { %v677_v3 = vpop.xlane.xlu0 %676 }
 0x29c   :  { %v679_v43 = vmul.f32 0.001953125, %v677_v3  ;;  %v700_v47 = vmul.f32 %v678_v31, %v678_v31  ;;  %v704_v13 = vsub.f32 %v2480_v37, %v678_v31  ;;  %v705_v41 = vsub.f32 %v2482_v44, %v678_v31 }
 0x29d   :  { %v697_v59 = vpop.xlane.xlu1 %696 }
 0x29e   :  { %v699_v49 = vmul.f32 0.001953125, %v697_v59  ;;  %v701_v51 = vmul.f32 %v679_v43, %v679_v43  ;;  %v708_v8 = vsub.f32 %v617_v7, %v679_v43  ;;  %v709_v29 = vsub.f32 %v619_v56, %v679_v43 }
 0x29f   :  { %v692_v34 = vpop.xlane.xlu0 %691  ;;  %v711_v44 = vsub.f32 %v2497_v32, %v679_v43 }
 0x2a0   :  { %v698_v5 = vmul.f32 0.001953125, %v692_v34  ;;  %v703_v21 = vsub.f32 %v699_v49, %v701_v51  ;;  %v710_v34 = vsub.f32 %v660_v22, %v679_v43 }
 0x2a2   :  { %v702_v9 = vsub.f32 %v698_v5, %v700_v47  ;;  %v713_v4 = vadd.f32 1e-05, %v703_v21  ;;  %v706_v5 = vsub.f32 %v2490_v28, %v678_v31 }
 0x2a4   :  { %v712_v19 = vadd.f32 1e-05, %v702_v9  ;;  %1679 = vrsqrt.f32 %v713_v4  ;;  %v707_v9 = vsub.f32 %v2492_v26, %v678_v31 }
 0x2a6   :  { %1681 = vrsqrt.f32 %v712_v19 }
 0x2ae   :  { %v1680_v25 = vpop.eup %1679 }
 0x2af   :  { %v720_v3 = vmul.f32 %v1680_v25, %v708_v8  ;;  %v721_v59 = vmul.f32 %v1680_v25, %v709_v29  ;;  %v722_v7 = vmul.f32 %v1680_v25, %v710_v34 }
 0x2b0   :  { %v1682_v15 = vpop.eup %1681 }
 0x2b1   :  { %v716_v18 = vmul.f32 %v1682_v15, %v704_v13  ;;  %v717_v0 = vmul.f32 %v1682_v15, %v705_v41  ;;  %v738_v35 = vmul.f32 %v732_v52, %v720_v3  ;;  %v739_v51 = vmul.f32 %v732_v52, %v721_v59 }
 0x2b2   :  { %v718_v37 = vmul.f32 %v1682_v15, %v706_v5  ;;  %v719_v19 = vmul.f32 %v1682_v15, %v707_v9 }
 0x2b3   :  { %v734_v47 = vmul.f32 %v727_v55, %v716_v18  ;;  %v2508_v49 = vadd.f32 %v750_v20, %v738_v35  ;;  %v735_v21 = vmul.f32 %v727_v55, %v717_v0  ;;  %v2518_v28 = vadd.f32 %v750_v20, %v739_v51  ;;  %v1239_v51 = vld [vmem:[%s3084_s9] sm:$0xff] }
 0x2b4   :  { %v740_v35 = vmul.f32 %v732_v52, %v722_v7  ;;  %v723_v18 = vmul.f32 %v1680_v25, %v711_v44  ;;  %v736_v4 = vmul.f32 %v727_v55, %v718_v37  ;;  %v737_v31 = vmul.f32 %v727_v55, %v719_v19 }
 0x2b5   :  { %v2510_v56 = vadd.f32 %v745_v30, %v734_v47  ;;  %762 = vrot.lane.b32.xlu0 %v2508_v49, %s1842_s24  ;;  %v2520_v22 = vadd.f32 %v745_v30, %v735_v21 }
 0x2b6   :  { %v2526_v0 = vadd.f32 %v750_v20, %v740_v35  ;;  %v741_v26 = vmul.f32 %v732_v52, %v723_v18  ;;  %v2528_v32 = vadd.f32 %v745_v30, %v736_v4  ;;  %v2536_v8 = vadd.f32 %v745_v30, %v737_v31  ;;  %v1025_v30 = vld [vmem:[%s3081_s6 + $0x8] sm:$0xff] }
 0x2b7   :  { %760 = vrot.lane.b32.xlu1 %v2510_v56, %s1842_s24  ;;  %1501 = vmatprep.mubr.msk.f32.mxu0 %vm574_vm0, %v1025_v30 }
 0x2b8   :  { %v2534_v43 = vadd.f32 %v750_v20, %v741_v26  ;;  %1504 = vmatprep.mubr.msk.f32.mxu1 %vm574_vm0, %v1025_v30 }
 0x2b9   :  { %766 = vrot.lane.b32.xlu0 %v2518_v28, %s1842_s24 }
 0x2bb   :  { %764 = vrot.lane.b32.xlu1 %v2520_v22, %s1842_s24 }
 0x2bd   :  { %770 = vrot.lane.b32.xlu0 %v2526_v0, %s1842_s24 }
 0x2bf   :  { %768 = vrot.lane.b32.xlu1 %v2528_v32, %s1842_s24 }
 0x2c1   :  { %774 = vrot.lane.b32.xlu0 %v2534_v43, %s1842_s24 }
 0x2c3   :  { %772 = vrot.lane.b32.xlu1 %v2536_v8, %s1842_s24 }
 0x2c5   :  { %794 = vrot.lane.b32.xlu0 %v2508_v49, %s1841_s13 }
 0x2c7   :  { %792 = vrot.lane.b32.xlu1 %v2510_v56, %s1841_s13 }
 0x2c9   :  { %798 = vrot.lane.b32.xlu0 %v2518_v28, %s1841_s13 }
 0x2cb   :  { %796 = vrot.lane.b32.xlu1 %v2520_v22, %s1841_s13 }
 0x2cd   :  { %802 = vrot.lane.b32.xlu0 %v2526_v0, %s1841_s13 }
 0x2cf   :  { %800 = vrot.lane.b32.xlu1 %v2528_v32, %s1841_s13 }
 0x2d1   :  { %806 = vrot.lane.b32.xlu0 %v2534_v43, %s1841_s13 }
 0x2d3   :  { %804 = vrot.lane.b32.xlu1 %v2536_v8, %s1841_s13 }
 0x2d5   :  { %826 = vrot.lane.b32.xlu0 %v2508_v49, %s1843_s0 }
 0x2d7   :  { %824 = vrot.lane.b32.xlu1 %v2510_v56, %s1843_s0 }
 0x2d9   :  { %830 = vrot.lane.b32.xlu0 %v2518_v28, %s1843_s0 }
 0x2db   :  { %828 = vrot.lane.b32.xlu1 %v2520_v22, %s1843_s0 }
 0x2dd   :  { %834 = vrot.lane.b32.xlu0 %v2526_v0, %s1843_s0 }
 0x2df   :  { %832 = vrot.lane.b32.xlu1 %v2528_v32, %s1843_s0 }
 0x2e1   :  { %838 = vrot.lane.b32.xlu0 %v2534_v43, %s1843_s0 }
 0x2e3   :  { %836 = vrot.lane.b32.xlu1 %v2536_v8, %s1843_s0 }
 0x2e5   :  { %858 = vrot.lane.b32.xlu0 %v2508_v49, %s1844_s17 }
 0x2e7   :  { %856 = vrot.lane.b32.xlu1 %v2510_v56, %s1844_s17 }
 0x2e9   :  { %862 = vrot.lane.b32.xlu0 %v2518_v28, %s1844_s17 }
 0x2eb   :  { %860 = vrot.lane.b32.xlu1 %v2520_v22, %s1844_s17 }
 0x2ed   :  { %866 = vrot.lane.b32.xlu0 %v2526_v0, %s1844_s17 }
 0x2ef   :  { %864 = vrot.lane.b32.xlu1 %v2528_v32, %s1844_s17 }
 0x2f1   :  { %870 = vrot.lane.b32.xlu0 %v2534_v43, %s1844_s17 }
 0x2f3   :  { %868 = vrot.lane.b32.xlu1 %v2536_v8, %s1844_s17 }
 0x2f5   :  { %898 = vrot.lane.b32.xlu0 %v2508_v49, %s1845_s19 }
 0x2f7   :  { %896 = vrot.lane.b32.xlu1 %v2510_v56, %s1845_s19 }
 0x2f9   :  { %902 = vrot.lane.b32.xlu0 %v2518_v28, %s1845_s19 }
 0x2fb   :  { %900 = vrot.lane.b32.xlu1 %v2520_v22, %s1845_s19 }
 0x2fd   :  { %906 = vrot.lane.b32.xlu0 %v2526_v0, %s1845_s19 }
 0x2ff   :  { %904 = vrot.lane.b32.xlu1 %v2528_v32, %s1845_s19 }
 0x301   :  { %910 = vrot.lane.b32.xlu0 %v2534_v43, %s1845_s19 }
 0x303   :  { %908 = vrot.lane.b32.xlu1 %v2536_v8, %s1845_s19 }
 0x305   :  { %930 = vrot.lane.b32.xlu0 %v2508_v49, %s1846_s20 }
 0x307   :  { %928 = vrot.lane.b32.xlu1 %v2510_v56, %s1846_s20 }
 0x309   :  { %934 = vrot.lane.b32.xlu0 %v2518_v28, %s1846_s20 }
 0x30b   :  { %932 = vrot.lane.b32.xlu1 %v2520_v22, %s1846_s20 }
 0x30d   :  { %938 = vrot.lane.b32.xlu0 %v2526_v0, %s1846_s20 }
 0x30f   :  { %936 = vrot.lane.b32.xlu1 %v2528_v32, %s1846_s20 }
 0x311   :  { %942 = vrot.lane.b32.xlu0 %v2534_v43, %s1846_s20 }
 0x313   :  { %940 = vrot.lane.b32.xlu1 %v2536_v8, %s1846_s20 }
 0x315   :  { %962 = vrot.lane.b32.xlu0 %v2508_v49, %s1847_s21 }
 0x317   :  { %960 = vrot.lane.b32.xlu1 %v2510_v56, %s1847_s21 }
 0x319   :  { %966 = vrot.lane.b32.xlu0 %v2518_v28, %s1847_s21 }
 0x31b   :  { %964 = vrot.lane.b32.xlu1 %v2520_v22, %s1847_s21 }
 0x31d   :  { %970 = vrot.lane.b32.xlu0 %v2526_v0, %s1847_s21 }
 0x31f   :  { %968 = vrot.lane.b32.xlu1 %v2528_v32, %s1847_s21 }
 0x321   :  { %974 = vrot.lane.b32.xlu0 %v2534_v43, %s1847_s21 }
 0x323   :  { %972 = vrot.lane.b32.xlu1 %v2536_v8, %s1847_s21 }
 0x325   :  { %994 = vrot.lane.b32.xlu0 %v2508_v49, %s1848_s22 }
 0x327   :  { %992 = vrot.lane.b32.xlu1 %v2510_v56, %s1848_s22  ;;  %v763_v52 = vpop.permute.xlu0 %762 }
 0x329   :  { %v761_v55 = vpop.permute.xlu1 %760  ;;  %998 = vrot.lane.b32.xlu0 %v2518_v28, %s1848_s22 }
 0x32b   :  { %996 = vrot.lane.b32.xlu1 %v2520_v22, %s1848_s22  ;;  %v767_v20 = vpop.permute.xlu0 %766 }
 0x32c   :  { %v781_v29 = vsel %vm115_vm1, %v763_v52, %v767_v20 }
 0x32d   :  { %v765_v25 = vpop.permute.xlu1 %764  ;;  %1002 = vrot.lane.b32.xlu0 %v2526_v0, %s1848_s22  ;;  %v789_v41 = vmul.f32 %v781_v29, %v2123_v16 }
 0x32e   :  { %v780_v13 = vsel %vm115_vm1, %v761_v55, %v765_v25 }
 0x32f   :  { %v785_v15 = vmul.f32 %v780_v13, %v2123_v16  ;;  %1000 = vrot.lane.b32.xlu1 %v2528_v32, %s1848_s22  ;;  %v771_v3 = vpop.permute.xlu0 %770  ;;  %v1240_v16 = vld [vmem:[%s3084_s9 + $0x8] sm:$0x1] }
 0x330   :  { %v779_v44 = vsel %vm115_vm1, %v767_v20, %v771_v3  ;;  %v1030_v20 = vld [vmem:[%s3082_s7] sm:$0xff] }
 0x331   :  { %v769_v59 = vpop.permute.xlu1 %768  ;;  %v2661_v34 = vpack.c.bf16 %v789_v41, %v785_v15  ;;  %1006 = vrot.lane.b32.xlu0 %v2534_v43, %s1848_s22  ;;  %v1032_v41 = vld [vmem:[%s3082_s7 + $0x10] sm:$0x3] }
 0x332   :  { %v778_v5 = vsel %vm115_vm1, %v765_v25, %v769_v59 }
 0x333   :  { %1004 = vrot.lane.b32.xlu1 %v2536_v8, %s1848_s22  ;;  %1512 = vmatprep.subr.bf16.mxu0 %v2661_v34  ;;  %v775_v47 = vpop.permute.xlu0 %774  ;;  %v786_v9 = vmul.f32 %v778_v5, %v2158_v36 }
 0x334   :  { %v777_v7 = vsel %vm115_vm1, %v771_v3, %v775_v47  ;;  %v783_v21 = vsel %vm115_vm1, %v775_v47, %v763_v52  ;;  %v1031_v52 = vld [vmem:[%s3082_s7 + $0x8] sm:$0xff] }
 0x335   :  { %v773_v37 = vpop.permute.xlu1 %772  ;;  %1248 = vperm.xlu0 %1674, %v1240_v16   ;;  %v788_v4 = vmul.f32 %v783_v21, %v2138_v24  ;;  %v791_v19 = vmul.f32 %v777_v7, %v2149_v33 }
 0x336   :  { %v776_v35 = vsel %vm115_vm1, %v769_v59, %v773_v37  ;;  %v782_v18 = vsel %vm115_vm1, %v773_v37, %v761_v55  ;;  %v790_v55 = vmul.f32 %v779_v44, %v2158_v36 }
 0x337   :  { %v784_v26 = vmul.f32 %v782_v18, %v2138_v24  ;;  %v787_v31 = vmul.f32 %v776_v35, %v2149_v33  ;;  %1243 = vperm.xlu1 %1675, %v1239_v51   ;;  %v795_v30 = vpop.permute.xlu0 %794 }
 0x338   :  { %v2702_v24 = vpack.c.bf16 %v790_v55, %v786_v9 }
 0x339   :  { %v2698_v29 = vpack.c.bf16 %v788_v4, %v784_v26  ;;  %v793_v25 = vpop.permute.xlu1 %792  ;;  %v2700_v13 = vpack.c.bf16 %v791_v19, %v787_v31  ;;  %1040 = vperm.xlu0 %1674, %v1031_v52  }
 0x33b   :  { %1035 = vperm.xlu1 %1675, %v1030_v20   ;;  %1514 = vmatpush1.bf16.msra.mxu0 %v2698_v29  ;;  %v799_v33 = vpop.permute.xlu0 %798 }
 0x33c   :  { %1548 = vmatprep.subr.bf16.mxu1 %v2700_v13  ;;  %v813_v36 = vsel %vm168_vm2, %v795_v30, %v799_v33 }
 0x33d   :  { %1550 = vmatpush1.bf16.msra.mxu1 %v2702_v24  ;;  %v797_v15 = vpop.permute.xlu1 %796  ;;  %v821_v59 = vmul.f32 %v813_v36, %v2187_v57 }
 0x33e   :  { %v812_v3 = vsel %vm168_vm2, %v793_v25, %v797_v15 }
 0x33f   :  { %v817_v5 = vmul.f32 %v812_v3, %v2187_v57  ;;  %1045 = vperm.xlu1 %1675, %v1032_v41   ;;  %v803_v16 = vpop.permute.xlu0 %802 }
 0x340   :  { %v811_v37 = vsel %vm168_vm2, %v799_v33, %v803_v16 }
 0x341   :  { %v801_v47 = vpop.permute.xlu1 %800  ;;  %v2716_v51 = vpack.c.bf16 %v821_v59, %v817_v5  ;;  %v822_v20 = vmul.f32 %v811_v37, %v2211_v23 }
 0x342   :  { %v810_v7 = vsel %vm168_vm2, %v797_v15, %v801_v47 }
 0x343   :  { %1516 = vmatprep.subr.bf16.mxu0 %v2716_v51  ;;  %v807_v21 = vpop.permute.xlu0 %806  ;;  %v818_v35 = vmul.f32 %v810_v7, %v2211_v23 }
 0x344   :  { %v809_v44 = vsel %vm168_vm2, %v803_v16, %v807_v21  ;;  %v815_v57 = vsel %vm168_vm2, %v807_v21, %v795_v30 }
 0x345   :  { %v805_v9 = vpop.permute.xlu1 %804  ;;  %v820_v19 = vmul.f32 %v815_v57, %v2202_v12  ;;  %v823_v26 = vmul.f32 %v809_v44, %v2214_v27  ;;  %v2741_v36 = vpack.c.bf16 %v822_v20, %v818_v35 }
 0x346   :  { %v808_v18 = vsel %vm168_vm2, %v801_v47, %v805_v9  ;;  %v814_v4 = vsel %vm168_vm2, %v805_v9, %v793_v25 }
 0x347   :  { %v816_v31 = vmul.f32 %v814_v4, %v2202_v12  ;;  %v819_v52 = vmul.f32 %v808_v18, %v2214_v27  ;;  %v827_v30 = vpop.permute.xlu0 %826 }
 0x349   :  { %v2737_v55 = vpack.c.bf16 %v820_v19, %v816_v31  ;;  %v825_v33 = vpop.permute.xlu1 %824  ;;  %v2739_v41 = vpack.c.bf16 %v823_v26, %v819_v52 }
 0x34b   :  { %1518 = vmatpush1.bf16.msra.mxu0 %v2737_v55  ;;  %1552 = vmatprep.subr.bf16.mxu1 %v2739_v41  ;;  %v831_v25 = vpop.permute.xlu0 %830 }
 0x34c   :  { %1554 = vmatpush1.bf16.msra.mxu1 %v2741_v36  ;;  %v845_v12 = vsel %vm221_vm3, %v827_v30, %v831_v25 }
 0x34d   :  { %v829_v27 = vpop.permute.xlu1 %828  ;;  %v853_v15 = vmul.f32 %v845_v12, %v2231_v46 }
 0x34e   :  { %v844_v23 = vsel %vm221_vm3, %v825_v33, %v829_v27 }
 0x34f   :  { %v849_v3 = vmul.f32 %v844_v23, %v2231_v46  ;;  %v835_v59 = vpop.permute.xlu0 %834 }
 0x350   :  { %v843_v21 = vsel %vm221_vm3, %v831_v25, %v835_v59 }
 0x351   :  { %v833_v5 = vpop.permute.xlu1 %832  ;;  %v2752_v16 = vpack.c.bf16 %v853_v15, %v849_v3  ;;  %v854_v31 = vmul.f32 %v843_v21, %v2249_v62 }
 0x352   :  { %v842_v47 = vsel %vm221_vm3, %v829_v27, %v833_v5 }
 0x353   :  { %1520 = vmatprep.subr.bf16.mxu0 %v2752_v16  ;;  %v839_v7 = vpop.permute.xlu0 %838  ;;  %v850_v57 = vmul.f32 %v842_v47, %v2249_v62 }
 0x354   :  { %v841_v37 = vsel %vm221_vm3, %v835_v59, %v839_v7  ;;  %v847_v44 = vsel %vm221_vm3, %v839_v7, %v827_v30 }
 0x355   :  { %v837_v46 = vpop.permute.xlu1 %836  ;;  %v852_v18 = vmul.f32 %v847_v44, %v2240_v53  ;;  %v855_v4 = vmul.f32 %v841_v37, %v2252_v63  ;;  %v2777_v12 = vpack.c.bf16 %v854_v31, %v850_v57  ;;  %v889_v44 = vmul.f32 %v2520_v22, %v2273_v39 }
 0x356   :  { %v840_v9 = vsel %vm221_vm3, %v833_v5, %v837_v46  ;;  %v846_v35 = vsel %vm221_vm3, %v837_v46, %v825_v33 }
 0x357   :  { %v848_v19 = vmul.f32 %v846_v35, %v2240_v53  ;;  %v851_v26 = vmul.f32 %v840_v9, %v2252_v63  ;;  %v859_v52 = vpop.permute.xlu0 %858  ;;  %v891_v35 = vmul.f32 %v2536_v8, %v2296_v58  ;;  %v895_v8 = vmul.f32 %v2534_v43, %v2296_v58 }
 0x359   :  { %v2773_v20 = vpack.c.bf16 %v852_v18, %v848_v19  ;;  %v857_v30 = vpop.permute.xlu1 %856  ;;  %v2775_v25 = vpack.c.bf16 %v855_v4, %v851_v26 }
 0x35b   :  { %1522 = vmatpush1.bf16.msra.mxu0 %v2773_v20  ;;  %1556 = vmatprep.subr.bf16.mxu1 %v2775_v25  ;;  %v863_v33 = vpop.permute.xlu0 %862 }
 0x35c   :  { %1558 = vmatpush1.bf16.msra.mxu1 %v2777_v12  ;;  %v877_v53 = vsel %vm274_vm4, %v859_v52, %v863_v33 }
 0x35d   :  { %v861_v63 = vpop.permute.xlu1 %860  ;;  %v885_v27 = vmul.f32 %v877_v53, %v2270_v38 }
 0x35e   :  { %v876_v62 = vsel %vm274_vm4, %v857_v30, %v861_v63 }
 0x35f   :  { %v881_v23 = vmul.f32 %v876_v62, %v2270_v38  ;;  %v867_v15 = vpop.permute.xlu0 %866 }
 0x360   :  { %v875_v7 = vsel %vm274_vm4, %v863_v33, %v867_v15 }
 0x361   :  { %v865_v3 = vpop.permute.xlu1 %864  ;;  %v2788_v59 = vpack.c.bf16 %v885_v27, %v881_v23  ;;  %v886_v22 = vmul.f32 %v875_v7, %v2305_v61 }
 0x362   :  { %v874_v5 = vsel %vm274_vm4, %v861_v63, %v865_v3  ;;  %v888_v63 = vmul.f32 %v2510_v56, %v2276_v42  ;;  %v894_v56 = vmul.f32 %v2526_v0, %v2312_v11 }
 0x363   :  { %1524 = vmatprep.subr.bf16.mxu0 %v2788_v59  ;;  %v871_v47 = vpop.permute.xlu0 %870  ;;  %v882_v46 = vmul.f32 %v874_v5, %v2305_v61  ;;  %v890_v61 = vmul.f32 %v2528_v32, %v2312_v11 }
 0x364   :  { %v873_v21 = vsel %vm274_vm4, %v867_v15, %v871_v47  ;;  %v879_v37 = vsel %vm274_vm4, %v871_v47, %v859_v52  ;;  %v893_v52 = vmul.f32 %v2518_v28, %v2273_v39  ;;  %v2831_v39 = vpack.c.bf16 %v895_v8, %v891_v35 }
 0x365   :  { %v869_v38 = vpop.permute.xlu1 %868  ;;  %v884_v18 = vmul.f32 %v879_v37, %v2285_v48  ;;  %v887_v4 = vmul.f32 %v873_v21, %v2308_v1  ;;  %v892_v28 = vmul.f32 %v2508_v49, %v2276_v42  ;;  %v2842_v62 = vpack.c.bf16 %v894_v56, %v890_v61 }
 0x366   :  { %v872_v57 = vsel %vm274_vm4, %v865_v3, %v869_v38  ;;  %v878_v9 = vsel %vm274_vm4, %v869_v38, %v857_v30 }
 0x367   :  { %v880_v19 = vmul.f32 %v878_v9, %v2285_v48  ;;  %v883_v26 = vmul.f32 %v872_v57, %v2308_v1  ;;  %v899_v31 = vpop.permute.xlu0 %898  ;;  %v2823_v48 = vpack.c.bf16 %v886_v22, %v882_v46  ;;  %v2825_v1 = vpack.c.bf16 %v893_v52, %v889_v44 }
 0x368   :  { %v2840_v43 = vpack.c.bf16 %v892_v28, %v888_v63 }
 0x369   :  { %v2815_v33 = vpack.c.bf16 %v884_v18, %v880_v19  ;;  %v897_v30 = vpop.permute.xlu1 %896  ;;  %v2817_v53 = vpack.c.bf16 %v887_v4, %v883_v26 }
 0x36b   :  { %1526 = vmatpush1.bf16.msra.mxu0 %v2815_v33  ;;  %1560 = vmatprep.subr.bf16.mxu1 %v2817_v53  ;;  %v903_v58 = vpop.permute.xlu0 %902 }
 0x36c   :  { %1528 = vmatprep.subr.bf16.mxu0 %v2825_v1  ;;  %1562 = vmatpush1.bf16.msra.mxu1 %v2823_v48  ;;  %v917_v49 = vsel %vm355_vm5, %v899_v31, %v903_v58 }
 0x36d   :  { %1564 = vmatprep.subr.bf16.mxu1 %v2831_v39  ;;  %v901_v32 = vpop.permute.xlu1 %900  ;;  %v924_v47 = vmul.f32 %v917_v49, %v2345_v54 }
 0x36e   :  { %v916_v27 = vsel %vm355_vm5, %v897_v30, %v901_v32 }
 0x36f   :  { %1530 = vmatpush1.bf16.msra.mxu0 %v2840_v43  ;;  %v907_v42 = vpop.permute.xlu0 %906  ;;  %v920_v23 = vmul.f32 %v916_v27, %v2345_v54 }
 0x370   :  { %1566 = vmatpush1.bf16.msra.mxu1 %v2842_v62  ;;  %v915_v11 = vsel %vm355_vm5, %v903_v58, %v907_v42 }
 0x371   :  { %v905_v0 = vpop.permute.xlu1 %904  ;;  %v925_v3 = vmul.f32 %v915_v11, %v2336_v45  ;;  %v2864_v46 = vpack.c.bf16 %v924_v47, %v920_v23 }
 0x372   :  { %v914_v15 = vsel %vm355_vm5, %v901_v32, %v905_v0 }
 0x373   :  { %v921_v5 = vmul.f32 %v914_v15, %v2336_v45  ;;  %v911_v7 = vpop.permute.xlu0 %910 }
 0x374   :  { %v913_v21 = vsel %vm355_vm5, %v907_v42, %v911_v7  ;;  %v919_v37 = vsel %vm355_vm5, %v911_v7, %v899_v31 }
 0x375   :  { %v909_v38 = vpop.permute.xlu1 %908  ;;  %v2862_v44 = vpack.c.bf16 %v925_v3, %v921_v5  ;;  %v926_v54 = vmul.f32 %v913_v21, %v2354_v14  ;;  %v927_v9 = vmul.f32 %v919_v37, %v2357_v17 }
 0x376   :  { %v912_v57 = vsel %vm355_vm5, %v905_v0, %v909_v38  ;;  %v918_v45 = vsel %vm355_vm5, %v909_v38, %v897_v30 }
 0x377   :  { %v922_v35 = vmul.f32 %v912_v57, %v2354_v14  ;;  %v923_v18 = vmul.f32 %v918_v45, %v2357_v17  ;;  %1532 = vmatprep.subr.bf16.mxu0 %v2862_v44  ;;  %v931_v4 = vpop.permute.xlu0 %930 }
 0x378   :  { %1534 = vmatpush1.bf16.msra.mxu0 %v2864_v46 }
 0x379   :  { %v2876_v19 = vpack.c.bf16 %v926_v54, %v922_v35  ;;  %v929_v26 = vpop.permute.xlu1 %928  ;;  %v2878_v22 = vpack.c.bf16 %v927_v9, %v923_v18 }
 0x37b   :  { %1568 = vmatprep.subr.bf16.mxu1 %v2878_v22  ;;  %v935_v31 = vpop.permute.xlu0 %934 }
 0x37c   :  { %1570 = vmatpush1.bf16.msra.mxu1 %v2876_v19  ;;  %v949_v30 = vsel %vm408_vm6, %v931_v4, %v935_v31 }
 0x37d   :  { %v933_v52 = vpop.permute.xlu1 %932  ;;  %v956_v32 = vmul.f32 %v949_v30, %v2383_v6 }
 0x37e   :  { %v948_v14 = vsel %vm408_vm6, %v929_v26, %v933_v52 }
 0x37f   :  { %v939_v17 = vpop.permute.xlu0 %938  ;;  %v952_v61 = vmul.f32 %v948_v14, %v2383_v6 }
 0x380   :  { %v947_v8 = vsel %vm408_vm6, %v935_v31, %v939_v17 }
 0x381   :  { %v937_v63 = vpop.permute.xlu1 %936  ;;  %v957_v58 = vmul.f32 %v947_v8, %v2374_v40  ;;  %v2900_v23 = vpack.c.bf16 %v956_v32, %v952_v61  ;;  %v3109_v32 = vld [vmem:[#allocation16_spill] sm:$0xff] }
 0x382   :  { %v946_v28 = vsel %vm408_vm6, %v933_v52, %v937_v63 }
 0x383   :  { %v953_v56 = vmul.f32 %v946_v28, %v2374_v40  ;;  %v943_v27 = vpop.permute.xlu0 %942 }
 0x384   :  { %v945_v42 = vsel %vm408_vm6, %v939_v17, %v943_v27  ;;  %v951_v49 = vsel %vm408_vm6, %v943_v27, %v931_v4  ;;  %v3110_v27 = vld [vmem:[#allocation17_spill] sm:$0xff] }
 0x385   :  { %v941_v11 = vpop.permute.xlu1 %940  ;;  %v2898_v0 = vpack.c.bf16 %v957_v58, %v953_v56  ;;  %v958_v6 = vmul.f32 %v945_v42, %v2392_v2  ;;  %v959_v3 = vmul.f32 %v951_v49, %v2395_v60 }
 0x386   :  { %v944_v15 = vsel %vm408_vm6, %v937_v63, %v941_v11  ;;  %v950_v40 = vsel %vm408_vm6, %v941_v11, %v929_v26  ;;  %v3108_v26 = vld [vmem:[#allocation15_spill] sm:$0xff] }
 0x387   :  { %v954_v5 = vmul.f32 %v944_v15, %v2392_v2  ;;  %v955_v47 = vmul.f32 %v950_v40, %v2395_v60  ;;  %1536 = vmatprep.subr.bf16.mxu0 %v2898_v0  ;;  %v963_v7 = vpop.permute.xlu0 %962 }
 0x388   :  { %1538 = vmatpush1.bf16.msra.mxu0 %v2900_v23 }
 0x389   :  { %v2912_v21 = vpack.c.bf16 %v958_v6, %v954_v5  ;;  %v961_v37 = vpop.permute.xlu1 %960  ;;  %v2914_v38 = vpack.c.bf16 %v959_v3, %v955_v47 }
 0x38b   :  { %1572 = vmatprep.subr.bf16.mxu1 %v2914_v38  ;;  %v967_v57 = vpop.permute.xlu0 %966 }
 0x38c   :  { %1574 = vmatpush1.bf16.msra.mxu1 %v2912_v21  ;;  %v981_v54 = vsel %vm461_vm7, %v963_v7, %v967_v57 }
 0x38d   :  { %v965_v45 = vpop.permute.xlu1 %964  ;;  %v988_v14 = vmul.f32 %v981_v54, %v2421_v50 }
 0x38e   :  { %v980_v2 = vsel %vm461_vm7, %v961_v37, %v965_v45 }
 0x38f   :  { %v971_v60 = vpop.permute.xlu0 %970  ;;  %v984_v18 = vmul.f32 %v980_v2, %v2421_v50 }
 0x390   :  { %v979_v9 = vsel %vm461_vm7, %v967_v57, %v971_v60 }
 0x391   :  { %v969_v35 = vpop.permute.xlu1 %968  ;;  %v989_v31 = vmul.f32 %v979_v9, %v3108_v26  ;;  %v2936_v28 = vpack.c.bf16 %v988_v14, %v984_v18 }
 0x392   :  { %v978_v4 = vsel %vm461_vm7, %v965_v45, %v969_v35 }
 0x393   :  { %v985_v52 = vmul.f32 %v978_v4, %v3108_v26  ;;  %v975_v17 = vpop.permute.xlu0 %974 }
 0x394   :  { %v977_v30 = vsel %vm461_vm7, %v971_v60, %v975_v17  ;;  %v983_v8 = vsel %vm461_vm7, %v975_v17, %v963_v7  ;;  %v3111_v60 = vld [vmem:[#allocation19_spill] sm:$0xff] }
 0x395   :  { %v973_v63 = vpop.permute.xlu1 %972  ;;  %v2934_v61 = vpack.c.bf16 %v989_v31, %v985_v52  ;;  %v990_v50 = vmul.f32 %v977_v30, %v3109_v32  ;;  %v991_v42 = vmul.f32 %v983_v8, %v3110_v27 }
 0x396   :  { %v976_v58 = vsel %vm461_vm7, %v969_v35, %v973_v63  ;;  %v982_v56 = vsel %vm461_vm7, %v973_v63, %v961_v37  ;;  %v3112_v35 = vld [vmem:[#allocation18_spill] sm:$0xff] }
 0x397   :  { %v986_v49 = vmul.f32 %v976_v58, %v3109_v32  ;;  %v987_v11 = vmul.f32 %v982_v56, %v3110_v27  ;;  %1540 = vmatprep.subr.bf16.mxu0 %v2934_v61  ;;  %v995_v15 = vpop.permute.xlu0 %994  ;;  %v3113_v56 = vld [vmem:[#allocation20_spill] sm:$0xff] }
 0x398   :  { %1542 = vmatpush1.bf16.msra.mxu0 %v2936_v28 }
 0x399   :  { %v2948_v40 = vpack.c.bf16 %v990_v50, %v986_v49  ;;  %v993_v6 = vpop.permute.xlu1 %992  ;;  %v2950_v3 = vpack.c.bf16 %v991_v42, %v987_v11  ;;  %v3114_v50 = vld [vmem:[#allocation21_spill] sm:$0xff] }
 0x39a   :  { %v1024_v11 = vld [vmem:[%s3081_s6] sm:$0xff] }
 0x39b   :  { %1576 = vmatprep.subr.bf16.mxu1 %v2950_v3  ;;  %v999_v5 = vpop.permute.xlu0 %998 }
 0x39c   :  { %1578 = vmatpush1.bf16.msra.mxu1 %v2948_v40  ;;  %v1013_v57 = vsel %vm514_vm8, %v995_v15, %v999_v5 }
 0x39d   :  { %v997_v47 = vpop.permute.xlu1 %996  ;;  %v1020_v26 = vmul.f32 %v3111_v60, %v1013_v57 }
 0x39e   :  { %v1012_v7 = vsel %vm514_vm8, %v993_v6, %v997_v47 }
 0x39f   :  { %v1003_v37 = vpop.permute.xlu0 %1002  ;;  %v1016_v54 = vmul.f32 %v3111_v60, %v1012_v7 }
 0x3a0   :  { %v1011_v45 = vsel %vm514_vm8, %v999_v5, %v1003_v37 }
 0x3a1   :  { %v1001_v2 = vpop.permute.xlu1 %1000  ;;  %v1021_v18 = vmul.f32 %v3112_v35, %v1011_v45  ;;  %v1545_v8 = vpack.c.bf16 %v1020_v26, %v1016_v54 }
 0x3a2   :  { %v1010_v9 = vsel %vm514_vm8, %v997_v47, %v1001_v2 }
 0x3a3   :  { %v1017_v4 = vmul.f32 %v3112_v35, %v1010_v9  ;;  %v1007_v31 = vpop.permute.xlu0 %1006 }
 0x3a4   :  { %v1009_v52 = vsel %vm514_vm8, %v1003_v37, %v1007_v31  ;;  %v1015_v14 = vsel %vm514_vm8, %v1007_v31, %v995_v15 }
 0x3a5   :  { %v1005_v17 = vpop.permute.xlu1 %1004  ;;  %v1543_v30 = vpack.c.bf16 %v1021_v18, %v1017_v4  ;;  %v1022_v32 = vmul.f32 %v3113_v56, %v1009_v52  ;;  %v1023_v27 = vmul.f32 %v3114_v50, %v1015_v14 }
 0x3a6   :  { %v1008_v63 = vsel %vm514_vm8, %v1001_v2, %v1005_v17  ;;  %v1014_v58 = vsel %vm514_vm8, %v1005_v17, %v993_v6  ;;  %v1026_v6 = vld [vmem:[%s3081_s6 + $0x10] sm:$0xff] }
 0x3a7   :  { %v1018_v42 = vmul.f32 %v3113_v56, %v1008_v63  ;;  %v1019_v49 = vmul.f32 %v3114_v50, %v1014_v58  ;;  %1544 = vmatprep.subr.bf16.mxu0 %v1543_v30 }
 0x3a8   :  { %1546 = vmatpush1.bf16.msra.mxu0 %v1545_v8 }
 0x3a9   :  { %v1581_v15 = vpack.c.bf16 %v1022_v32, %v1018_v42  ;;  %1584 = vmatprep.subr.bf16.mxu0 %v2661_v34  ;;  %v1579_v5 = vpack.c.bf16 %v1023_v27, %v1019_v49  ;;  %v1029_v34 = vld [vmem:[%s3081_s6 + $0x28] sm:$0x3] }
 0x3ab   :  { %1122 = vmatmul.mubr.f32.vlgmr.msra.gmra.mrb[4].mxu0 %v1024_v11  ;;  %1580 = vmatprep.subr.bf16.mxu1 %v1579_v5 }
 0x3ac   :  { %1582 = vmatpush1.bf16.msra.mxu1 %v1581_v15  ;;  %1586 = vmatpush1.bf16.msra.mxu0 %v2698_v29  ;;  %v1028_v29 = vld [vmem:[%s3081_s6 + $0x20] sm:$0x3]  ;;  %s1850_s6 = smov [#allocation8]  }
 0x3ad   :  { %1588 = vmatprep.subr.bf16.mxu0 %v2716_v51  ;;  %1620 = vmatprep.subr.bf16.mxu1 %v2700_v13  ;;  %v1236_v13 = vld [vmem:[#allocation7 + $0x8] sm:$0xff]  ;;  %v1238_v51 = vld [vmem:[#allocation7 + $0x18] sm:$0x1]  ;;  %s1464_s30 = sshll.u32 %s1850_s6, 4  ;;  %s1465_s30 = int_to_ptr.vmem [resolvable:$true] %s1464_s30 }
 0x3ae   :  { %1502 = vmatprep.mubr.msk.f32.mxu0 %vm574_vm0, %v1027_v10  ;;  %s1781_s12 = scalar_lea.vmem %s1465_s30, 1536  ;;  %p1786_p11 = scmp.lt.s32.totalorder %s1465_s30, %s1465_s30 }
 0x3af   :  { %1128 = vmatmul.mubr.f32.gmra.mrb[6].mxu0 %v1026_v6  ;;  %1205 = vmatmul.mubr.f32.vlgmr.msra.gmra.mrb[4].mxu1 %v1024_v11  ;;  %p1782_p10 = scmp.ne.s32.totalorder %s1465_s30, %s1781_s12  ;;  %p1787_p12 = scmp.lt.s32.totalorder %s1781_s12, %s1781_s12 }
 0x3b0   :  { %1590 = vmatpush1.bf16.msra.mxu0 %v2737_v55  ;;  %1622 = vmatpush1.bf16.msra.mxu1 %v2702_v24  ;;  %v1235_v24 = vld [vmem:[#allocation7] sm:$0xff]  ;;  %v1237_v55 = vld [vmem:[#allocation7 + $0x10] sm:$0x1] }
 0x3b1   :  { %1592 = vmatprep.subr.bf16.mxu0 %v2752_v16  ;;  %1624 = vmatprep.subr.bf16.mxu1 %v2739_v41  ;;  %p1788_p13 = por %p1787_p12, %p1786_p11 }
 0x3b2   :  { %1503 = vmatprep.mubr.msk.f32.mxu0 %vm574_vm0, %v1029_v34  ;;  %1505 = vmatprep.mubr.msk.f32.mxu1 %vm574_vm0, %v1027_v10 }
 0x3b3   :  { %1134 = vmatmul.mubr.f32.gmra.mrb[8].mxu0 %v1028_v29  ;;  %1211 = vmatmul.mubr.f32.gmra.mrb[6].mxu1 %v1026_v6  ;;  %p1789_p0 = pnand %p1788_p13, %p1782_p10 }
 0x3b4   :  { %1594 = vmatpush1.bf16.msra.mxu0 %v2773_v20  ;;  %1626 = vmatpush1.bf16.msra.mxu1 %v2741_v36  ;;  %v3035_v36 = vpop.permute.xlu0 %1248 }
 0x3b5   :  { %1596 = vmatprep.subr.bf16.mxu0 %v2788_v59  ;;  %1628 = vmatprep.subr.bf16.mxu1 %v2775_v25 }
 0x3b6   :  { %1506 = vmatprep.mubr.msk.f32.mxu1 %vm574_vm0, %v1029_v34  ;;  %1507 = vmatprep.mubr.msk.f32.mxu0 %vm574_vm0, %v1236_v13  ;;  %v3033_v41 = vpop.permute.xlu1 %1243 }
 0x3b7   :  { %1217 = vmatmul.mubr.f32.gmra.mrb[8].mxu1 %v1028_v29 }
 0x3b8   :  { %1598 = vmatpush1.bf16.msra.mxu0 %v2815_v33  ;;  %1630 = vmatpush1.bf16.msra.mxu1 %v2777_v12  ;;  %v1041_v33 = vpop.permute.xlu0 %1040 }
 0x3b9   :  { %1600 = vmatprep.subr.bf16.mxu0 %v2825_v1  ;;  %1632 = vmatprep.subr.bf16.mxu1 %v2817_v53 }
 0x3ba   :  { %1509 = vmatprep.mubr.msk.f32.mxu1 %vm574_vm0, %v1236_v13  ;;  %v1036_v16 = vpop.permute.xlu1 %1035 }
 0x3bc   :  { %1602 = vmatpush1.bf16.msra.mxu0 %v2840_v43  ;;  %1634 = vmatpush1.bf16.msra.mxu1 %v2823_v48 }
 0x3bd   :  { %1604 = vmatprep.subr.bf16.mxu0 %v2862_v44  ;;  %1636 = vmatprep.subr.bf16.mxu1 %v2831_v39 }
 0x3c0   :  { %1606 = vmatpush1.bf16.msra.mxu0 %v2864_v46  ;;  %1638 = vmatpush1.bf16.msra.mxu1 %v2842_v62 }
 0x3c1   :  { %1608 = vmatprep.subr.bf16.mxu0 %v2898_v0  ;;  %1640 = vmatprep.subr.bf16.mxu1 %v2878_v22 }
 0x3c4   :  { %1610 = vmatpush1.bf16.msra.mxu0 %v2900_v23  ;;  %1642 = vmatpush1.bf16.msra.mxu1 %v2876_v19  ;;  %v1046_v19 = vpop.permute.xlu1 %1045 }
 0x3c5   :  { %1612 = vmatprep.subr.bf16.mxu0 %v2934_v61  ;;  %1644 = vmatprep.subr.bf16.mxu1 %v2914_v38 }
 0x3c8   :  { %1614 = vmatpush1.bf16.msra.mxu0 %v2936_v28  ;;  %1646 = vmatpush1.bf16.msra.mxu1 %v2912_v21 }
 0x3c9   :  { %1616 = vmatprep.subr.bf16.mxu0 %v1543_v30  ;;  %1648 = vmatprep.subr.bf16.mxu1 %v2950_v3 }
 0x3cc   :  { %1618 = vmatpush1.bf16.msra.mxu0 %v1545_v8  ;;  %1650 = vmatpush1.bf16.msra.mxu1 %v2948_v40 }
 0x3cd   :  { %1652 = vmatprep.subr.bf16.mxu1 %v1579_v5 }
 0x3cf   :  { %1322 = vmatmul.mubr.f32.vlgmr.msra.gmra.mrb[10].mxu0 %v1235_v24 }
 0x3d0   :  { %1654 = vmatpush1.bf16.msra.mxu1 %v1581_v15  ;;  %1508 = vmatprep.mubr.msk.f32.mxu0 %vm574_vm0, %v1238_v51 }
 0x3d3   :  { %1328 = vmatmul.mubr.f32.gmra.mrb[12].mxu0 %v1237_v55  ;;  %1399 = vmatmul.mubr.f32.vlgmr.msra.gmra.mrb[10].mxu1 %v1235_v24 }
 0x3d4   :  { %1510 = vmatprep.mubr.msk.f32.mxu1 %vm574_vm0, %v1238_v51 }
 0x3d7   :  { %1405 = vmatmul.mubr.f32.gmra.mrb[12].mxu1 %v1237_v55 }
 0x47e   :  { %v1123_v20 = vpop.f32.mrb[4].mxu0 }
 0x47f   :  { %v1124_v25 = vadd.f32 %v1123_v20, %v1036_v16  ;;  %v1125_v12 = vpop.f32.mrb[5].mxu0 }
 0x480   :  { %v1126_v59 = vadd.f32 %v1125_v12, %v1036_v16 }
 0x481   :  { %1223 = vst [vmem:[#allocation8] sm:$0xff] %v1124_v25 }
 0x482   :  { %1224 = vst [vmem:[#allocation8 + $0x8] sm:$0xff] %v1126_v59  ;;  %v1129_v53 = vpop.f32.mrb[6].mxu0  ;;  %v1206_v48 = vpop.f32.mrb[4].mxu1 }
 0x483   :  { %v1130_v1 = vadd.f32 %v1129_v53, %v1041_v33  ;;  %v1207_v39 = vadd.f32 %v1206_v48, %v1036_v16  ;;  %v1131_v43 = vpop.f32.mrb[7].mxu0  ;;  %v1208_v62 = vpop.f32.mrb[5].mxu1 }
 0x484   :  { %v1132_v44 = vadd.f32 %v1131_v43, %v1041_v33  ;;  %v1209_v46 = vadd.f32 %v1208_v62, %v1036_v16 }
 0x485   :  { %1227 = vst [vmem:[#allocation8 + $0x20] sm:$0xff] %v1130_v1  ;;  %1225 = vst [vmem:[#allocation8 + $0x10] sm:$0xff] %v1207_v39 }
 0x486   :  { %1228 = vst [vmem:[#allocation8 + $0x28] sm:$0xff] %v1132_v44  ;;  %1226 = vst [vmem:[#allocation8 + $0x18] sm:$0xff] %v1209_v46  ;;  %v1135_v22 = vpop.f32.mrb[8].mxu0  ;;  %v1212_v0 = vpop.f32.mrb[6].mxu1 }
 0x487   :  { %v1136_v23 = vadd.f32 %v1135_v22, %v1046_v19  ;;  %v1213_v21 = vadd.f32 %v1212_v0, %v1041_v33  ;;  %v1137_v38 = vpop.f32.mrb[9].mxu0  ;;  %v1214_v61 = vpop.f32.mrb[7].mxu1 }
 0x488   :  { %v1138_v28 = vadd.f32 %v1137_v38, %v1046_v19  ;;  %v1215_v40 = vadd.f32 %v1214_v61, %v1041_v33 }
 0x489   :  { %1231 = vst [vmem:[#allocation8 + $0x40] sm:$0x3] %v1136_v23  ;;  %1229 = vst [vmem:[#allocation8 + $0x30] sm:$0xff] %v1213_v21 }
 0x48a   :  { %1232 = vst [vmem:[#allocation8 + $0x48] sm:$0x3] %v1138_v28  ;;  %1230 = vst [vmem:[#allocation8 + $0x38] sm:$0xff] %v1215_v40  ;;  %v1218_v3 = vpop.f32.mrb[8].mxu1 }
 0x48b   :  { %v1219_v47 = vadd.f32 %v1218_v3, %v1046_v19  ;;  %v1220_v7 = vpop.f32.mrb[9].mxu1 }
 0x48c   :  { %v1221_v37 = vadd.f32 %v1220_v7, %v1046_v19 }
 0x48d   :  { %1233 = vst [vmem:[#allocation8 + $0x50] sm:$0x3] %v1219_v47 }
 0x48e   :  { %1234 = vst [vmem:[#allocation8 + $0x58] sm:$0x3] %v1221_v37 }
 0x48f   :  { %1792 = shalt.err (!%p1789_p0)
}
 0x490   :  { %s1793_s5 = scalar_lea.hbm %s3085_s10, 1536 }
 0x491   :  { %p1794_p1 = scmp.ne.s32.totalorder %s3085_s10, %s1793_s5  ;;  %p1797_p2 = scmp.lt.u32.totalorder %s1793_s5, %s3085_s10 }
 0x493   :  { %p1799_p3 = pnand %p1797_p2, %p1794_p1 }
 0x495   :  { %1802 = shalt.err (!%p1799_p3)
}
 0x496   :  { %1470 = dma.vmem_to_hbm [thread:$0]  %s1465_s30, 1536, %s3085_s10, [#allocation4], %s1837_s2, %s1837_s2, %s1838_s18  }
 0x497   :  { %s1851_s10 = smov [#allocation9]  }
 0x498   :  { %s1476_s0 = sshll.u32 %s1851_s10, 4  ;;  %s1477_s0 = int_to_ptr.vmem [resolvable:$true] %s1476_s0 }
 0x499   :  { %s1803_s17 = scalar_lea.vmem %s1477_s0, 1024  ;;  %p1808_p5 = scmp.lt.s32.totalorder %s1477_s0, %s1477_s0 }
 0x49a   :  { %p1804_p4 = scmp.ne.s32.totalorder %s1477_s0, %s1803_s17  ;;  %p1809_p6 = scmp.lt.s32.totalorder %s1803_s17, %s1803_s17 }
 0x49c   :  { %p1810_p7 = por %p1809_p6, %p1808_p5 }
 0x49e   :  { %p1811_p8 = pnand %p1810_p7, %p1804_p4 }
 0x4a2   :  { %v1323_v57 = vpop.f32.mrb[10].mxu0 }
 0x4a3   :  { %v1324_v45 = vadd.f32 %v1323_v57, %v3033_v41  ;;  %v1325_v2 = vpop.f32.mrb[11].mxu0 }
 0x4a4   :  { %v1326_v60 = vadd.f32 %v1325_v2, %v3033_v41 }
 0x4a5   :  { %v1411_v54 = vsub.f32 0.0, %v1324_v45 }
 0x4a6   :  { %v1412_v9 = vsub.f32 0.0, %v1326_v60  ;;  %v1329_v35 = vpop.f32.mrb[12].mxu0  ;;  %v1400_v18 = vpop.f32.mrb[10].mxu1 }
 0x4a7   :  { %v1419_v4 = vmul.f32 1.442695, %v1411_v54  ;;  %v1330_v26 = vadd.f32 %v1329_v35, %v3035_v36  ;;  %v1401_v31 = vadd.f32 %v1400_v18, %v3033_v41  ;;  %v1331_v52 = vpop.f32.mrb[13].mxu0  ;;  %v1402_v14 = vpop.f32.mrb[11].mxu1 }
 0x4a8   :  { %v1421_v17 = vmul.f32 1.442695, %v1412_v9  ;;  %v1332_v30 = vadd.f32 %v1331_v52, %v3035_v36  ;;  %v1403_v8 = vadd.f32 %v1402_v14, %v3033_v41 }
 0x4a9   :  { %1683 = vpow2.f32 %v1419_v4  ;;  %v1415_v63 = vsub.f32 0.0, %v1330_v26  ;;  %v1413_v58 = vsub.f32 0.0, %v1401_v31 }
 0x4aa   :  { %1685 = vpow2.f32 %v1421_v17  ;;  %v1416_v56 = vsub.f32 0.0, %v1332_v30  ;;  %v1414_v32 = vsub.f32 0.0, %v1403_v8  ;;  %v1406_v50 = vpop.f32.mrb[12].mxu1 }
 0x4ab   :  { %v1427_v27 = vmul.f32 1.442695, %v1415_v63  ;;  %v1423_v42 = vmul.f32 1.442695, %v1413_v58  ;;  %v1407_v49 = vadd.f32 %v1406_v50, %v3035_v36  ;;  %v1408_v11 = vpop.f32.mrb[13].mxu1 }
 0x4ac   :  { %v1429_v15 = vmul.f32 1.442695, %v1416_v56  ;;  %v1425_v5 = vmul.f32 1.442695, %v1414_v32  ;;  %v1409_v10 = vadd.f32 %v1408_v11, %v3035_v36 }
 0x4ad   :  { %1687 = vpow2.f32 %v1427_v27  ;;  %v1417_v6 = vsub.f32 0.0, %v1407_v49 }
 0x4ae   :  { %1689 = vpow2.f32 %v1423_v42  ;;  %v1418_v34 = vsub.f32 0.0, %v1409_v10 }
 0x4af   :  { %1691 = vpow2.f32 %v1429_v15  ;;  %v1431_v29 = vmul.f32 1.442695, %v1417_v6 }
 0x4b0   :  { %1693 = vpow2.f32 %v1425_v5  ;;  %v1433_v13 = vmul.f32 1.442695, %v1418_v34 }
 0x4b1   :  { %1695 = vpow2.f32 %v1431_v29 }
 0x4b2   :  { %1697 = vpow2.f32 %v1433_v13 }
 0x4b3   :  { %v1684_v24 = vpop.eup %1683 }
 0x4b4   :  { %v1686_v51 = vpop.eup %1685  ;;  %v1435_v55 = vadd.f32 1.0, %v1684_v24 }
 0x4b5   :  { %v1436_v41 = vadd.f32 1.0, %v1686_v51 }
 0x4b6   :  { %1699 = vrcp.f32 %v1435_v55 }
 0x4b7   :  { %v1688_v16 = vpop.eup %1687  ;;  %1701 = vrcp.f32 %v1436_v41 }
 0x4b8   :  { %v1690_v20 = vpop.eup %1689  ;;  %v1439_v25 = vadd.f32 1.0, %v1688_v16 }
 0x4b9   :  { %v1692_v36 = vpop.eup %1691  ;;  %v1437_v12 = vadd.f32 1.0, %v1690_v20 }
 0x4ba   :  { %v1694_v59 = vpop.eup %1693  ;;  %1703 = vrcp.f32 %v1439_v25  ;;  %v1440_v33 = vadd.f32 1.0, %v1692_v36 }
 0x4bb   :  { %v1696_v53 = vpop.eup %1695  ;;  %1705 = vrcp.f32 %v1437_v12  ;;  %v1438_v48 = vadd.f32 1.0, %v1694_v59 }
 0x4bc   :  { %v1698_v1 = vpop.eup %1697  ;;  %1707 = vrcp.f32 %v1440_v33  ;;  %v1441_v39 = vadd.f32 1.0, %v1696_v53 }
 0x4bd   :  { %1709 = vrcp.f32 %v1438_v48  ;;  %v1442_v43 = vadd.f32 1.0, %v1698_v1 }
 0x4be   :  { %1711 = vrcp.f32 %v1441_v39 }
 0x4bf   :  { %1713 = vrcp.f32 %v1442_v43 }
 0x4c0   :  { %v1700_v62 = vpop.eup %1699 }
 0x4c1   :  { %v1702_v44 = vpop.eup %1701  ;;  %1451 = vst [vmem:[#allocation9] sm:$0xff] %v1700_v62 }
 0x4c2   :  { %1452 = vst [vmem:[#allocation9 + $0x8] sm:$0xff] %v1702_v44 }
 0x4c4   :  { %v1704_v46 = vpop.eup %1703 }
 0x4c5   :  { %v1706_v19 = vpop.eup %1705  ;;  %1455 = vst [vmem:[#allocation9 + $0x20] sm:$0x1] %v1704_v46 }
 0x4c6   :  { %v1708_v22 = vpop.eup %1707  ;;  %1453 = vst [vmem:[#allocation9 + $0x10] sm:$0xff] %v1706_v19 }
 0x4c7   :  { %v1710_v0 = vpop.eup %1709  ;;  %1456 = vst [vmem:[#allocation9 + $0x28] sm:$0x1] %v1708_v22 }
 0x4c8   :  { %v1712_v23 = vpop.eup %1711  ;;  %1454 = vst [vmem:[#allocation9 + $0x18] sm:$0xff] %v1710_v0 }
 0x4c9   :  { %v1714_v21 = vpop.eup %1713  ;;  %1457 = vst [vmem:[#allocation9 + $0x30] sm:$0x1] %v1712_v23 }
 0x4ca   :  { %1458 = vst [vmem:[#allocation9 + $0x38] sm:$0x1] %v1714_v21 }
 0x4cb   :  { %1814 = shalt.err (!%p1811_p8)
}
 0x4cc   :  { %s1815_s21 = scalar_lea.hbm %s3086_s11, 1024 }
 0x4cd   :  { %p1816_p9 = scmp.ne.s32.totalorder %s3086_s11, %s1815_s21  ;;  %p1819_p10 = scmp.lt.u32.totalorder %s1815_s21, %s3086_s11 }
 0x4cf   :  { %p1821_p11 = pnand %p1819_p10, %p1816_p9 }
 0x4d1   :  { %1824 = shalt.err (!%p1821_p11)
}
 0x4d2   :  { %1482 = dma.vmem_to_hbm [thread:$0]  %s1477_s0, 1024, %s3086_s11, [#allocation10], %s1837_s2, %s1837_s2, %s1838_s18  }
 0x4d3   :  { %1829 = dma.done.wait [#allocation4], 1536  }
 0x4d4   :  { %1830 = vsyncadd [#allocation4], 4294965760 }
 0x4d5   :  { %1831 = dma.done.wait [#allocation10], 1024  }
 0x4d6   :  { %1832 = vsyncadd [#allocation10], 4294966272 }
 0x4d7   :  { %1489 = vsyncpa [#allocation3], 1 }
 0x4d8   :  { %1490 = vsyncpa [#allocation6], 1 }
 0x4d9   :  { %1491 = vsyncpa [#allocation4], 1 }
 0x4da   :  { %1492 = vsyncpa [#allocation10], 1 }

</bundles_post_ra>
